<compile_context>
chip_gen: v5e
topology: v5e:2x2
jax: 0.10.0
libtpu: 0.0.40
codegen_flags: <defaults>
</compile_context>

<pallas_src>
import jax
import jax.numpy as jnp
from jax import lax
from jax.experimental import pallas as pl
from jax.experimental.pallas import tpu as pltpu


# ----------------------------------------------------------------------------
# helpers
# ----------------------------------------------------------------------------
def _round_up(x, m):
    return ((x + m - 1) // m) * m


def _batch_blocking(batch):
    """Returns (batch_block, padded_batch); batch_block is the grid tile (mult of 8)."""
    b_pad = _round_up(batch, 8)
    if b_pad <= 128:
        return b_pad, b_pad
    b_pad = _round_up(b_pad, 128)
    return 128, b_pad


def _sigmoid(x):
    # tanh formulation keeps the activation on the EUP slot (no f32 divide on VPU).
    return 0.5 * (jnp.tanh(0.5 * x) + 1.0)


_W_NAMES = ("wih_f", "whh_f", "b_f", "wih_b", "whh_b", "b_b",
            "wtag_f", "wtag_b", "btag", "start", "end", "trans_t")


def _weight_args(kp):
    arrays = [kp[n] for n in _W_NAMES]
    specs = [pl.BlockSpec(a.shape, lambda b: (0, 0)) for a in arrays]
    return arrays, specs


def _scratch_shapes(T, b_blk, Hp, K, with_emis):
    s = []
    if with_emis:
        s.append(pltpu.VMEM((T, b_blk, K), jnp.float32))       # emissions (VMEM only)
    s += [pltpu.VMEM((T, b_blk, Hp), jnp.float32),             # forward hidden states
          pltpu.VMEM((T * b_blk, 4 * Hp), jnp.float32),        # hoisted fwd input gates
          pltpu.VMEM((T * b_blk, 4 * Hp), jnp.float32)]        # hoisted bwd input gates
    return s


def _compiler_params():
    return pltpu.CompilerParams(dimension_semantics=("parallel",),
                                vmem_limit_bytes=32 * 1024 * 1024)


# ----------------------------------------------------------------------------
# shared BiLSTM + hidden2tag body (writes emissions into emis_ref)
# ----------------------------------------------------------------------------
def _bilstm_emissions_body(emb_ref, wih_f_ref, whh_f_ref, bf_ref,
                           wih_b_ref, whh_b_ref, bb_ref,
                           wtf_ref, wtb_ref, btag_ref,
                           emis_ref, hf_ref, gxf_ref, gxb_ref):
    T, Bblk, Ep = emb_ref.shape
    Hp = whh_f_ref.shape[0]

    # Hoisted input projection: one big MXU matmul per direction (bias folded in).
    # (T, Bblk, Ep) -> (T*Bblk, Ep) is layout-free: Bblk % 8 == 0, Ep % 128 == 0.
    x2 = emb_ref[...].reshape(T * Bblk, Ep)
    gxf_ref[...] = (jnp.dot(x2, wih_f_ref[...], preferred_element_type=jnp.float32)
                    + bf_ref[...])
    gxb_ref[...] = (jnp.dot(x2, wih_b_ref[...], preferred_element_type=jnp.float32)
                    + bb_ref[...])

    def cell(gx, h, c, whh_ref):
        gates = gx + jnp.dot(h, whh_ref[...], preferred_element_type=jnp.float32)
        # each gate occupies its own 128-lane-aligned block of width Hp
        i = _sigmoid(gates[:, 0 * Hp:1 * Hp])
        f = _sigmoid(gates[:, 1 * Hp:2 * Hp])
        g = jnp.tanh(gates[:, 2 * Hp:3 * Hp])
        o = _sigmoid(gates[:, 3 * Hp:4 * Hp])
        c = f * c + i * g
        h = o * jnp.tanh(c)
        return h, c

    zeros = jnp.zeros((Bblk, Hp), jnp.float32)

    def fwd_body(t, carry):
        h, c = carry
        row = pl.multiple_of(t * Bblk, Bblk)
        h, c = cell(gxf_ref[pl.ds(row, Bblk), :], h, c, whh_f_ref)
        hf_ref[t] = h
        return (h, c)

    lax.fori_loop(0, T, fwd_body, (zeros, zeros))

    def bwd_body(i, carry):
        h, c = carry
        t = T - 1 - i
        row = pl.multiple_of(t * Bblk, Bblk)
        h, c = cell(gxb_ref[pl.ds(row, Bblk), :], h, c, whh_b_ref)
        # hidden2tag fused here: concat(h_fwd, h_bwd) @ W_tag.T == two matmuls
        emis_ref[t] = (
            jnp.dot(hf_ref[t], wtf_ref[...], preferred_element_type=jnp.float32)
            + jnp.dot(h, wtb_ref[...], preferred_element_type=jnp.float32)
            + btag_ref[...])
        return (h, c)

    lax.fori_loop(0, T, bwd_body, (zeros, zeros))


# ----------------------------------------------------------------------------
# Fused kernel 1: BiLSTM -> emissions (VMEM) -> Viterbi DP  (decode mode)
# ----------------------------------------------------------------------------
def bilstm_viterbi_kernel(emb_ref,
                          wih_f_ref, whh_f_ref, bf_ref,
                          wih_b_ref, whh_b_ref, bb_ref,
                          wtf_ref, wtb_ref, btag_ref,
                          start_ref, end_ref, trans_t_ref,
                          score_ref, hist_ref,
                          emis_ref, hf_ref, gxf_ref, gxb_ref):
    _bilstm_emissions_body(emb_ref, wih_f_ref, whh_f_ref, bf_ref,
                           wih_b_ref, whh_b_ref, bb_ref,
                           wtf_ref, wtb_ref, btag_ref,
                           emis_ref, hf_ref, gxf_ref, gxb_ref)

    T, Bblk, K = emis_ref.shape
    trans_t = trans_t_ref[...]                        # (K_cur, K_prev)
    hist_ref[0] = jnp.zeros((Bblk, K), jnp.int32)

    def body(t, score):
        # ns[b, cur, prev] = score[b, prev] + transitions[prev, cur]
        ns = score[:, None, :] + trans_t[None, :, :]
        m = jnp.max(ns, axis=-1, keepdims=True)       # single max, reused below
        lane = lax.broadcasted_iota(jnp.int32, ns.shape, 2)
        # first index achieving the max (== torch/jnp argmax tie-break)
        hist_ref[t] = jnp.min(jnp.where(ns == m, lane, K), axis=-1)
        return m[:, :, 0] + emis_ref[t]

    score = lax.fori_loop(1, T, body, start_ref[...] + emis_ref[0])
    score_ref[...] = score + end_ref[...]


# ----------------------------------------------------------------------------
# Fused kernel 2: BiLSTM -> emissions (VMEM) -> CRF log-partition + gold emissions
# ----------------------------------------------------------------------------
def bilstm_crf_loss_kernel(emb_ref, tags_ref,
                           wih_f_ref, whh_f_ref, bf_ref,
                           wih_b_ref, whh_b_ref, bb_ref,
                           wtf_ref, wtb_ref, btag_ref,
                           start_ref, end_ref, trans_t_ref,
                           denom_ref, gold_ref,
                           emis_ref, hf_ref, gxf_ref, gxb_ref):
    _bilstm_emissions_body(emb_ref, wih_f_ref, whh_f_ref, bf_ref,
                           wih_b_ref, whh_b_ref, bb_ref,
                           wtf_ref, wtb_ref, btag_ref,
                           emis_ref, hf_ref, gxf_ref, gxb_ref)

    T, Bblk, K = emis_ref.shape
    trans_t = trans_t_ref[...]
    lane_k = lax.broadcasted_iota(jnp.int32, (Bblk, K), 1)

    def gold_emit(t):
        # gold emission score at step t via one-hot select (tags_ref[t]: (Bblk, 1))
        oh = (lane_k == tags_ref[t]).astype(jnp.float32)
        return jnp.sum(emis_ref[t] * oh, axis=-1, keepdims=True)

    def body(t, carry):
        score, gold = carry
        ns = score[:, None, :] + trans_t[None, :, :]
        m = jnp.max(ns, axis=-1, keepdims=True)       # single max, reused
        score = jnp.log(jnp.sum(jnp.exp(ns - m), axis=-1)) + m[:, :, 0] + emis_ref[t]
        return score, gold + gold_emit(t)

    score, gold = lax.fori_loop(
        1, T, body, (start_ref[...] + emis_ref[0], gold_emit(0)))
    score = score + end_ref[...]
    m = jnp.max(score, axis=-1, keepdims=True)
    denom_ref[...] = jnp.log(jnp.sum(jnp.exp(score - m), axis=-1, keepdims=True)) + m
    gold_ref[...] = gold


# ----------------------------------------------------------------------------
# Emissions-only kernel (verification path only; production kernels keep
# emissions in VMEM and never write them to HBM)
# ----------------------------------------------------------------------------
def bilstm_emissions_kernel(emb_ref,
                            wih_f_ref, whh_f_ref, bf_ref,
                            wih_b_ref, whh_b_ref, bb_ref,
                            wtf_ref, wtb_ref, btag_ref,
                            start_ref, end_ref, trans_t_ref,
                            emis_ref, hf_ref, gxf_ref, gxb_ref):
    del start_ref, end_ref, trans_t_ref
    _bilstm_emissions_body(emb_ref, wih_f_ref, whh_f_ref, bf_ref,
                           wih_b_ref, whh_b_ref, bb_ref,
                           wtf_ref, wtb_ref, btag_ref,
                           emis_ref, hf_ref, gxf_ref, gxb_ref)


# ----------------------------------------------------------------------------
# pallas_call wrappers
# ----------------------------------------------------------------------------
def _viterbi_call(kp, emb_tm, b_blk):
    T, b_pad, Ep = emb_tm.shape
    Hp = kp["whh_f"].shape[0]
    K = kp["btag"].shape[1]
    w_arrays, w_specs = _weight_args(kp)
    return pl.pallas_call(
        bilstm_viterbi_kernel,
        out_shape=(jax.ShapeDtypeStruct((b_pad, K), jnp.float32),
                   jax.ShapeDtypeStruct((T, b_pad, K), jnp.int32)),
        grid=(b_pad // b_blk,),
        in_specs=[pl.BlockSpec((T, b_blk, Ep), lambda b: (0, b, 0))] + w_specs,
        out_specs=(pl.BlockSpec((b_blk, K), lambda b: (b, 0)),
                   pl.BlockSpec((T, b_blk, K), lambda b: (0, b, 0))),
        scratch_shapes=_scratch_shapes(T, b_blk, Hp, K, with_emis=True),
        compiler_params=_compiler_params(),
    )(emb_tm, *w_arrays)


def _loss_call(kp, emb_tm, tags_tm, b_blk):
    T, b_pad, Ep = emb_tm.shape
    Hp = kp["whh_f"].shape[0]
    K = kp["btag"].shape[1]
    w_arrays, w_specs = _weight_args(kp)
    return pl.pallas_call(
        bilstm_crf_loss_kernel,
        out_shape=(jax.ShapeDtypeStruct((b_pad, 1), jnp.float32),
                   jax.ShapeDtypeStruct((b_pad, 1), jnp.float32)),
        grid=(b_pad // b_blk,),
        in_specs=([pl.BlockSpec((T, b_blk, Ep), lambda b: (0, b, 0)),
                   pl.BlockSpec((T, b_blk, 1), lambda b: (0, b, 0))]
                  + w_specs),
        out_specs=(pl.BlockSpec((b_blk, 1), lambda b: (b, 0)),
                   pl.BlockSpec((b_blk, 1), lambda b: (b, 0))),
        scratch_shapes=_scratch_shapes(T, b_blk, Hp, K, with_emis=True),
        compiler_params=_compiler_params(),
    )(emb_tm, tags_tm, *w_arrays)


def _emissions_debug(kp, emb_tm, b_blk):
    T, b_pad, Ep = emb_tm.shape
    Hp = kp["whh_f"].shape[0]
    K = kp["btag"].shape[1]
    w_arrays, w_specs = _weight_args(kp)
    return pl.pallas_call(
        bilstm_emissions_kernel,
        out_shape=jax.ShapeDtypeStruct((T, b_pad, K), jnp.float32),
        grid=(b_pad // b_blk,),
        in_specs=[pl.BlockSpec((T, b_blk, Ep), lambda b: (0, b, 0))] + w_specs,
        out_specs=pl.BlockSpec((T, b_blk, K), lambda b: (0, b, 0)),
        scratch_shapes=_scratch_shapes(T, b_blk, Hp, K, with_emis=False),
        compiler_params=_compiler_params(),
    )(emb_tm, *w_arrays)


# ----------------------------------------------------------------------------
# Wrapper (== BiLSTM_CRF.forward)
# ----------------------------------------------------------------------------
def _prep_emb(kp, sentences):
    B, _ = sentences.shape
    b_blk, b_pad = _batch_blocking(B)
    # time-major gather straight from the lane-padded table: no (B,T,E)->(T,B,E)
    # activation transpose (only the tiny int index array is transposed).
    emb_tm = jnp.take(kp["emb_table"], sentences.T.astype(jnp.int32), axis=0)
    if b_pad != B:
        emb_tm = jnp.pad(emb_tm, ((0, 0), (0, b_pad - B), (0, 0)))
    return emb_tm, b_blk, b_pad


def forward(params, sentences, tags=None):
    B, T = sentences.shape
    kp = params["kernel"]
    emb_tm, b_blk, b_pad = _prep_emb(kp, sentences)

    if tags is None:
        # CRF.decode  (mask=None)
        score, hist = _viterbi_call(kp, emb_tm, b_blk)
        score, hist = score[:B], hist[:, :B]
        last = jnp.argmax(score, axis=-1).astype(jnp.int32)              # (B,)

        def back_step(cur, h_t):                                         # backtrace (glue)
            nxt = jnp.take_along_axis(h_t, cur[:, None], axis=1)[:, 0]
            return nxt, nxt

        _, earlier = lax.scan(back_step, last, hist[1:], reverse=True)   # (T-1, B)
        path_tm = jnp.concatenate([earlier, last[None, :]], axis=0)      # (T, B)
        return path_tm.T                                                 # (B, T)

    # loss = -CRF(emissions, tags, reduction='mean')
    tags_i = tags.astype(jnp.int32)
    tags_tm = tags_i.T[:, :, None]                                       # (T, B, 1)
    if b_pad != B:
        tags_tm = jnp.pad(tags_tm, ((0, 0), (0, b_pad - B), (0, 0)))
    denom, gold = _loss_call(kp, emb_tm, tags_tm, b_blk)
    denom, gold = denom[:B, 0], gold[:B, 0]
    # remaining gold-path terms need only tags + transition params: vectorized glue
    num_struct = (params["start_transitions"][tags_i[:, 0]]
                  + jnp.sum(params["transitions"][tags_i[:, :-1], tags_i[:, 1:]], axis=1)
                  + params["end_transitions"][tags_i[:, -1]])
    llh = gold + num_struct - denom
    return -jnp.mean(llh)


# ----------------------------------------------------------------------------
# Deterministic parameter init (shapes follow the nn.Module __init__) + the
# lane-aligned, gate-padded kernel layout.
# ----------------------------------------------------------------------------
def init_params(key, vocab_size, tagset_size, embedding_dim=100, hidden_dim=128,
                pad_idx=0):
    H = hidden_dim // 2
    ks = jax.random.split(key, 15)
    u = lambda k, shape, s: jax.random.uniform(k, shape, jnp.float32, -s, s)
    s_lstm = 1.0 / (H ** 0.5)
    s_lin = 1.0 / (hidden_dim ** 0.5)

    emb = jax.random.normal(ks[0], (vocab_size, embedding_dim), jnp.float32)
    p = {
        "emb_table": emb.at[pad_idx].set(0.0),          # padding_idx row = 0
        "w_ih_f": u(ks[1], (4 * H, embedding_dim), s_lstm),
        "w_hh_f": u(ks[2], (4 * H, H), s_lstm),
        "b_ih_f": u(ks[3], (4 * H,), s_lstm),
        "b_hh_f": u(ks[4], (4 * H,), s_lstm),
        "w_ih_b": u(ks[5], (4 * H, embedding_dim), s_lstm),
        "w_hh_b": u(ks[6], (4 * H, H), s_lstm),
        "b_ih_b": u(ks[7], (4 * H,), s_lstm),
        "b_hh_b": u(ks[8], (4 * H,), s_lstm),
        "w_tag": u(ks[9], (tagset_size, hidden_dim), s_lin),
        "b_tag": u(ks[10], (tagset_size,), s_lin),
        "start_transitions": u(ks[11], (tagset_size,), 0.1),
        "end_transitions": u(ks[12], (tagset_size,), 0.1),
        "transitions": u(ks[13], (tagset_size, tagset_size), 0.1),
    }

    # ---- kernel layout: per-gate 128-lane aligned padding (exact: pads are 0) ----
    Hp = _round_up(max(H, 1), 128)
    Ep = _round_up(embedding_dim, 128)
    K = tagset_size

    def pad_gates_in(w):      # (4H, E) -> (Ep, 4Hp), transposed, gate-aligned
        out = jnp.zeros((Ep, 4 * Hp), jnp.float32)
        for g in range(4):
            out = out.at[:embedding_dim, g * Hp:g * Hp + H].set(
                w[g * H:(g + 1) * H, :].T)
        return out

    def pad_gates_hh(w):      # (4H, H) -> (Hp, 4Hp)
        out = jnp.zeros((Hp, 4 * Hp), jnp.float32)
        for g in range(4):
            out = out.at[:H, g * Hp:g * Hp + H].set(w[g * H:(g + 1) * H, :].T)
        return out

    def pad_gates_b(b):       # (4H,) -> (1, 4Hp)
        out = jnp.zeros((1, 4 * Hp), jnp.float32)
        for g in range(4):
            out = out.at[0, g * Hp:g * Hp + H].set(b[g * H:(g + 1) * H])
        return out

    def pad_tag(w_half):      # (K, H) -> (Hp, K)
        return jnp.zeros((Hp, K), jnp.float32).at[:H, :].set(w_half.T)

    emb_pad = jnp.zeros((vocab_size, Ep), jnp.float32).at[:, :embedding_dim].set(
        p["emb_table"])

    p["kernel"] = dict(
        emb_table=emb_pad,
        wih_f=pad_gates_in(p["w_ih_f"]), whh_f=pad_gates_hh(p["w_hh_f"]),
        b_f=pad_gates_b(p["b_ih_f"] + p["b_hh_f"]),
        wih_b=pad_gates_in(p["w_ih_b"]), whh_b=pad_gates_hh(p["w_hh_b"]),
        b_b=pad_gates_b(p["b_ih_b"] + p["b_hh_b"]),
        wtag_f=pad_tag(p["w_tag"][:, :H]), wtag_b=pad_tag(p["w_tag"][:, H:]),
        btag=p["b_tag"][None, :],
        start=p["start_transitions"][None, :],
        end=p["end_transitions"][None, :],
        trans_t=p["transitions"].T,
    )
    return p


# ----------------------------------------------------------------------------
# Pure-JAX references (for verification only)
# ----------------------------------------------------------------------------
def _lstm_scan(emb_tm, w_ih, w_hh, b_ih, b_hh, reverse):
    _, B, _ = emb_tm.shape
    H = w_hh.shape[1]

    def step(carry, x):
        h, c = carry
        g = x @ w_ih.T + h @ w_hh.T + b_ih + b_hh
        i = _sigmoid(g[:, :H]); f = _sigmoid(g[:, H:2 * H])
        gg = jnp.tanh(g[:, 2 * H:3 * H]); o = _sigmoid(g[:, 3 * H:])
        c = f * c + i * gg
        h = o * jnp.tanh(c)
        return (h, c), h

    init = (jnp.zeros((B, H), jnp.float32), jnp.zeros((B, H), jnp.float32))
    _, hs = lax.scan(step, init, emb_tm, reverse=reverse)
    return hs


def ref_emissions_tm(p, emb_tm):
    hf = _lstm_scan(emb_tm, p["w_ih_f"], p["w_hh_f"], p["b_ih_f"], p["b_hh_f"], False)
    hb = _lstm_scan(emb_tm, p["w_ih_b"], p["w_hh_b"], p["b_ih_b"], p["b_hh_b"], True)
    h = jnp.concatenate([hf, hb], axis=-1)
    return h @ p["w_tag"].T + p["b_tag"]


def ref_viterbi_decode(emis_tm, start, end, trans):
    T, _, _ = emis_tm.shape
    score = start + emis_tm[0]
    hist = []
    for i in range(1, T):
        ns = score[:, :, None] + trans[None] + emis_tm[i][:, None, :]
        hist.append(jnp.argmax(ns, axis=1))
        score = jnp.max(ns, axis=1)
    score = score + end
    last = jnp.argmax(score, axis=-1)
    out = [last]
    for h in reversed(hist):
        last = jnp.take_along_axis(h, last[:, None], axis=1)[:, 0]
        out.append(last)
    out.reverse()
    return jnp.stack(out, axis=1)


def ref_loss(emis_tm, tags, start, end, trans):
    T, B, _ = emis_tm.shape
    score = start + emis_tm[0]
    for i in range(1, T):
        ns = score[:, :, None] + trans[None] + emis_tm[i][:, None, :]
        score = jax.nn.logsumexp(ns, axis=1)
    denom = jax.nn.logsumexp(score + end, axis=-1)
    tags_tm = tags.T
    ar = jnp.arange(B)
    num = start[tags_tm[0]] + emis_tm[0, ar, tags_tm[0]]
    for i in range(1, T):
        num = num + trans[tags_tm[i - 1], tags_tm[i]] + emis_tm[i, ar, tags_tm[i]]
    num = num + end[tags_tm[-1]]
    return -jnp.mean(num - denom)


# ----------------------------------------------------------------------------
if __name__ == "__main__":
    VOCAB, TAGS, EMB_DIM, HID_DIM = 50, 8, 100, 128
    B, T = 2, 8

    root = jax.random.PRNGKey(0)
    pkey, skey, tkey = jax.random.split(root, 3)
    params = init_params(pkey, VOCAB, TAGS, EMB_DIM, HID_DIM, pad_idx=0)
    sentences = jax.random.randint(skey, (B, T), 0, VOCAB, dtype=jnp.int32)
    tags = jax.random.randint(tkey, (B, T), 0, TAGS, dtype=jnp.int32)

    # forward(sentences)            -> decoded best path (B, T)
    path = forward(params, sentences)
    # forward(sentences, tags)      -> -CRF log-likelihood (mean reduction)
    loss = forward(params, sentences, tags)
    jax.block_until_ready((path, loss))

    # ------------------ verification against pure-JAX reference ------------------
    kp = params["kernel"]
    emb_tm_pad, b_blk, _ = _prep_emb(kp, sentences)
    emis_k = _emissions_debug(kp, emb_tm_pad, b_blk)[:, :B, :]

    emb_tm_ref = jnp.transpose(jnp.take(params["emb_table"], sentences, axis=0),
                               (1, 0, 2))
    emis_r = ref_emissions_tm(params, emb_tm_ref)
    assert float(jnp.max(jnp.abs(emis_k - emis_r))) < 5e-2, "emissions mismatch"

    path_r = ref_viterbi_decode(emis_k, params["start_transitions"],
                                params["end_transitions"], params["transitions"])
    assert bool(jnp.all(path == path_r)), "viterbi path mismatch"

    loss_r = ref_loss(emis_k, tags, params["start_transitions"],
                      params["end_transitions"], params["transitions"])
    assert abs(float(loss) - float(loss_r)) < 1e-2, "crf loss mismatch"

    print("KERNEL_OK")
</pallas_src>

<mosaic_0001>
module attributes {stable_mosaic.version = 11 : i64} {
  func.func @bilstm_viterbi_kernel(%arg0: i32, %arg1: memref<8x8x128xf32, #tpu.memory_space<vmem>>, %arg2: memref<128x512xf32, #tpu.memory_space<vmem>>, %arg3: memref<128x512xf32, #tpu.memory_space<vmem>>, %arg4: memref<1x512xf32, #tpu.memory_space<vmem>>, %arg5: memref<128x512xf32, #tpu.memory_space<vmem>>, %arg6: memref<128x512xf32, #tpu.memory_space<vmem>>, %arg7: memref<1x512xf32, #tpu.memory_space<vmem>>, %arg8: memref<128x8xf32, #tpu.memory_space<vmem>>, %arg9: memref<128x8xf32, #tpu.memory_space<vmem>>, %arg10: memref<1x8xf32, #tpu.memory_space<vmem>>, %arg11: memref<1x8xf32, #tpu.memory_space<vmem>>, %arg12: memref<1x8xf32, #tpu.memory_space<vmem>>, %arg13: memref<8x8xf32, #tpu.memory_space<vmem>>, %arg14: memref<8x8xf32, #tpu.memory_space<vmem>>, %arg15: memref<8x8x8xi32, #tpu.memory_space<vmem>>, %arg16: memref<8x8x8xf32, #tpu.memory_space<vmem>>, %arg17: memref<8x8x128xf32, #tpu.memory_space<vmem>>, %arg18: memref<64x512xf32, #tpu.memory_space<vmem>>, %arg19: memref<64x512xf32, #tpu.memory_space<vmem>>) attributes {dimension_semantics = [#tpu.dimension_semantics<parallel>], iteration_bounds = array<i64: 1>, scalar_prefetch = 0 : i64, scratch_operands = 4 : i64, tpu.core_type = #tpu.core_type<tc>, window_params = [{transform_indices = @transform_0, window_bounds = array<i64: 8, 8, 128>}, {pipeline_mode = #tpu.pipeline_mode<synchronous>, transform_indices = @transform_1, window_bounds = array<i64: 128, 512>}, {pipeline_mode = #tpu.pipeline_mode<synchronous>, transform_indices = @transform_2, window_bounds = array<i64: 128, 512>}, {pipeline_mode = #tpu.pipeline_mode<synchronous>, transform_indices = @transform_3, window_bounds = array<i64: 1, 512>}, {pipeline_mode = #tpu.pipeline_mode<synchronous>, transform_indices = @transform_4, window_bounds = array<i64: 128, 512>}, {pipeline_mode = #tpu.pipeline_mode<synchronous>, transform_indices = @transform_5, window_bounds = array<i64: 128, 512>}, {pipeline_mode = #tpu.pipeline_mode<synchronous>, transform_indices = @transform_6, window_bounds = array<i64: 1, 512>}, {pipeline_mode = #tpu.pipeline_mode<synchronous>, transform_indices = @transform_7, window_bounds = array<i64: 128, 8>}, {pipeline_mode = #tpu.pipeline_mode<synchronous>, transform_indices = @transform_8, window_bounds = array<i64: 128, 8>}, {pipeline_mode = #tpu.pipeline_mode<synchronous>, transform_indices = @transform_9, window_bounds = array<i64: 1, 8>}, {pipeline_mode = #tpu.pipeline_mode<synchronous>, transform_indices = @transform_10, window_bounds = array<i64: 1, 8>}, {pipeline_mode = #tpu.pipeline_mode<synchronous>, transform_indices = @transform_11, window_bounds = array<i64: 1, 8>}, {pipeline_mode = #tpu.pipeline_mode<synchronous>, transform_indices = @transform_12, window_bounds = array<i64: 8, 8>}, {transform_indices = @transform_13, window_bounds = array<i64: 8, 8>}, {transform_indices = @transform_14, window_bounds = array<i64: 8, 8, 8>}]} {
    %c0 = arith.constant 0 : index
    %c0_0 = arith.constant 0 : index
    %c0_1 = arith.constant 0 : index
    %0 = vector.load %arg1[%c0, %c0_0, %c0_1] : memref<8x8x128xf32, #tpu.memory_space<vmem>>, vector<8x8x128xf32>
    %1 = vector.shape_cast %0 : vector<8x8x128xf32> to vector<64x128xf32>
    %c0_2 = arith.constant 0 : index
    %c0_3 = arith.constant 0 : index
    %2 = vector.load %arg2[%c0_2, %c0_3] : memref<128x512xf32, #tpu.memory_space<vmem>>, vector<128x512xf32>
    %cst = arith.constant dense<0.000000e+00> : vector<64x512xf32>
    %3 = tpu.matmul %1, %2, %cst {dimension_numbers = #tpu.dot_dimension_numbers<[1], [0], [0], [1], [0, 0, 1, 1], [], []>} : vector<64x128xf32>, vector<128x512xf32>, vector<64x512xf32> -> vector<64x512xf32>
    %c0_4 = arith.constant 0 : index
    %c0_5 = arith.constant 0 : index
    %4 = vector.load %arg4[%c0_4, %c0_5] : memref<1x512xf32, #tpu.memory_space<vmem>>, vector<1x512xf32>
    %5 = vector.broadcast %4 : vector<1x512xf32> to vector<64x512xf32>
    %6 = arith.addf %3, %5 : vector<64x512xf32>
    %c0_6 = arith.constant 0 : index
    %c0_7 = arith.constant 0 : index
    %7 = vector.load %arg18[%c0_6, %c0_7] : memref<64x512xf32, #tpu.memory_space<vmem>>, vector<64x512xf32>
    tpu.vector_store %arg18[%c0_6, %c0_7], %6 {strides = array<i32>} : memref<64x512xf32, #tpu.memory_space<vmem>>, vector<64x512xf32>,
    %c0_8 = arith.constant 0 : index
    %c0_9 = arith.constant 0 : index
    %8 = vector.load %arg5[%c0_8, %c0_9] : memref<128x512xf32, #tpu.memory_space<vmem>>, vector<128x512xf32>
    %cst_10 = arith.constant dense<0.000000e+00> : vector<64x512xf32>
    %9 = tpu.matmul %1, %8, %cst_10 {dimension_numbers = #tpu.dot_dimension_numbers<[1], [0], [0], [1], [0, 0, 1, 1], [], []>} : vector<64x128xf32>, vector<128x512xf32>, vector<64x512xf32> -> vector<64x512xf32>
    %c0_11 = arith.constant 0 : index
    %c0_12 = arith.constant 0 : index
    %10 = vector.load %arg7[%c0_11, %c0_12] : memref<1x512xf32, #tpu.memory_space<vmem>>, vector<1x512xf32>
    %11 = vector.broadcast %10 : vector<1x512xf32> to vector<64x512xf32>
    %12 = arith.addf %9, %11 : vector<64x512xf32>
    %c0_13 = arith.constant 0 : index
    %c0_14 = arith.constant 0 : index
    %13 = vector.load %arg19[%c0_13, %c0_14] : memref<64x512xf32, #tpu.memory_space<vmem>>, vector<64x512xf32>
    tpu.vector_store %arg19[%c0_13, %c0_14], %12 {strides = array<i32>} : memref<64x512xf32, #tpu.memory_space<vmem>>, vector<64x512xf32>,
    %cst_15 = arith.constant 0.000000e+00 : f32
    %14 = vector.broadcast %cst_15 : f32 to vector<8x128xf32>
    %c0_i32 = arith.constant 0 : i32
    %c8_i32 = arith.constant 8 : i32
    %15 = arith.addi %c0_i32, %c8_i32 : i32
    %c1_i32 = arith.constant 1 : i32
    %16:2 = scf.for %arg20 = %c0_i32 to %15 step %c1_i32 iter_args(%arg21 = %14, %arg22 = %14) -> (vector<8x128xf32>, vector<8x128xf32>)  : i32 {
      %c8_i32_39 = arith.constant 8 : i32
      %35 = arith.muli %arg20, %c8_i32_39 : i32
      %36 = tpu.assume_multiple %35, 8 : i32
      %37 = arith.index_cast %36 : i32 to index
      %c0_40 = arith.constant 0 : index
      %38 = vector.load %arg18[%37, %c0_40] : memref<64x512xf32, #tpu.memory_space<vmem>>, vector<8x512xf32>
      %c0_41 = arith.constant 0 : index
      %c0_42 = arith.constant 0 : index
      %39 = vector.load %arg3[%c0_41, %c0_42] : memref<128x512xf32, #tpu.memory_space<vmem>>, vector<128x512xf32>
      %cst_43 = arith.constant dense<0.000000e+00> : vector<8x512xf32>
      %40 = tpu.matmul %arg21, %39, %cst_43 {dimension_numbers = #tpu.dot_dimension_numbers<[1], [0], [0], [1], [0, 0, 1, 1], [], []>} : vector<8x128xf32>, vector<128x512xf32>, vector<8x512xf32> -> vector<8x512xf32>
      %41 = arith.addf %38, %40 : vector<8x512xf32>
      %42 = vector.extract_strided_slice %41 {offsets = [0, 0], sizes = [8, 128], strides = [1, 1]} : vector<8x512xf32> to vector<8x128xf32>
      %cst_44 = arith.constant 5.000000e-01 : f32
      %43 = vector.broadcast %cst_44 : f32 to vector<8x128xf32>
      %44 = arith.mulf %43, %42 : vector<8x128xf32>
      %45 = math.tanh %44 : vector<8x128xf32>
      %cst_45 = arith.constant 1.000000e+00 : f32
      %46 = vector.broadcast %cst_45 : f32 to vector<8x128xf32>
      %47 = arith.addf %45, %46 : vector<8x128xf32>
      %cst_46 = arith.constant 5.000000e-01 : f32
      %48 = vector.broadcast %cst_46 : f32 to vector<8x128xf32>
      %49 = arith.mulf %48, %47 : vector<8x128xf32>
      %50 = vector.extract_strided_slice %41 {offsets = [0, 128], sizes = [8, 128], strides = [1, 1]} : vector<8x512xf32> to vector<8x128xf32>
      %cst_47 = arith.constant 5.000000e-01 : f32
      %51 = vector.broadcast %cst_47 : f32 to vector<8x128xf32>
      %52 = arith.mulf %51, %50 : vector<8x128xf32>
      %53 = math.tanh %52 : vector<8x128xf32>
      %cst_48 = arith.constant 1.000000e+00 : f32
      %54 = vector.broadcast %cst_48 : f32 to vector<8x128xf32>
      %55 = arith.addf %53, %54 : vector<8x128xf32>
      %cst_49 = arith.constant 5.000000e-01 : f32
      %56 = vector.broadcast %cst_49 : f32 to vector<8x128xf32>
      %57 = arith.mulf %56, %55 : vector<8x128xf32>
      %58 = vector.extract_strided_slice %41 {offsets = [0, 256], sizes = [8, 128], strides = [1, 1]} : vector<8x512xf32> to vector<8x128xf32>
      %59 = math.tanh %58 : vector<8x128xf32>
      %60 = vector.extract_strided_slice %41 {offsets = [0, 384], sizes = [8, 128], strides = [1, 1]} : vector<8x512xf32> to vector<8x128xf32>
      %cst_50 = arith.constant 5.000000e-01 : f32
      %61 = vector.broadcast %cst_50 : f32 to vector<8x128xf32>
      %62 = arith.mulf %61, %60 : vector<8x128xf32>
      %63 = math.tanh %62 : vector<8x128xf32>
      %cst_51 = arith.constant 1.000000e+00 : f32
      %64 = vector.broadcast %cst_51 : f32 to vector<8x128xf32>
      %65 = arith.addf %63, %64 : vector<8x128xf32>
      %cst_52 = arith.constant 5.000000e-01 : f32
      %66 = vector.broadcast %cst_52 : f32 to vector<8x128xf32>
      %67 = arith.mulf %66, %65 : vector<8x128xf32>
      %68 = arith.mulf %57, %arg22 : vector<8x128xf32>
      %69 = arith.mulf %49, %59 : vector<8x128xf32>
      %70 = arith.addf %68, %69 : vector<8x128xf32>
      %71 = math.tanh %70 : vector<8x128xf32>
      %72 = arith.mulf %67, %71 : vector<8x128xf32>
      %73 = arith.index_cast %arg20 : i32 to index
      %c0_53 = arith.constant 0 : index
      %c0_54 = arith.constant 0 : index
      %74 = vector.load %arg17[%73, %c0_53, %c0_54] : memref<8x8x128xf32, #tpu.memory_space<vmem>>, vector<1x8x128xf32>
      %75 = vector.shape_cast %74 : vector<1x8x128xf32> to vector<8x128xf32>
      %76 = vector.shape_cast %72 : vector<8x128xf32> to vector<1x8x128xf32>
      tpu.vector_store %arg17[%73, %c0_53, %c0_54], %76 {strides = array<i32>} : memref<8x8x128xf32, #tpu.memory_space<vmem>>, vector<1x8x128xf32>,
      scf.yield %72, %70 : vector<8x128xf32>, vector<8x128xf32>
    }
    %c8_i32_16 = arith.constant 8 : i32
    %c0_i32_17 = arith.constant 0 : i32
    %c8_i32_18 = arith.constant 8 : i32
    %17 = arith.addi %c0_i32_17, %c8_i32_18 : i32
    %c1_i32_19 = arith.constant 1 : i32
    %18:2 = scf.for %arg20 = %c0_i32_17 to %17 step %c1_i32_19 iter_args(%arg21 = %14, %arg22 = %14) -> (vector<8x128xf32>, vector<8x128xf32>)  : i32 {
      %c7_i32_39 = arith.constant 7 : i32
      %35 = arith.subi %c7_i32_39, %arg20 : i32
      %c8_i32_40 = arith.constant 8 : i32
      %36 = arith.muli %35, %c8_i32_40 : i32
      %37 = tpu.assume_multiple %36, 8 : i32
      %38 = arith.index_cast %37 : i32 to index
      %c0_41 = arith.constant 0 : index
      %39 = vector.load %arg19[%38, %c0_41] : memref<64x512xf32, #tpu.memory_space<vmem>>, vector<8x512xf32>
      %c0_42 = arith.constant 0 : index
      %c0_43 = arith.constant 0 : index
      %40 = vector.load %arg6[%c0_42, %c0_43] : memref<128x512xf32, #tpu.memory_space<vmem>>, vector<128x512xf32>
      %cst_44 = arith.constant dense<0.000000e+00> : vector<8x512xf32>
      %41 = tpu.matmul %arg21, %40, %cst_44 {dimension_numbers = #tpu.dot_dimension_numbers<[1], [0], [0], [1], [0, 0, 1, 1], [], []>} : vector<8x128xf32>, vector<128x512xf32>, vector<8x512xf32> -> vector<8x512xf32>
      %42 = arith.addf %39, %41 : vector<8x512xf32>
      %43 = vector.extract_strided_slice %42 {offsets = [0, 0], sizes = [8, 128], strides = [1, 1]} : vector<8x512xf32> to vector<8x128xf32>
      %cst_45 = arith.constant 5.000000e-01 : f32
      %44 = vector.broadcast %cst_45 : f32 to vector<8x128xf32>
      %45 = arith.mulf %44, %43 : vector<8x128xf32>
      %46 = math.tanh %45 : vector<8x128xf32>
      %cst_46 = arith.constant 1.000000e+00 : f32
      %47 = vector.broadcast %cst_46 : f32 to vector<8x128xf32>
      %48 = arith.addf %46, %47 : vector<8x128xf32>
      %cst_47 = arith.constant 5.000000e-01 : f32
      %49 = vector.broadcast %cst_47 : f32 to vector<8x128xf32>
      %50 = arith.mulf %49, %48 : vector<8x128xf32>
      %51 = vector.extract_strided_slice %42 {offsets = [0, 128], sizes = [8, 128], strides = [1, 1]} : vector<8x512xf32> to vector<8x128xf32>
      %cst_48 = arith.constant 5.000000e-01 : f32
      %52 = vector.broadcast %cst_48 : f32 to vector<8x128xf32>
      %53 = arith.mulf %52, %51 : vector<8x128xf32>
      %54 = math.tanh %53 : vector<8x128xf32>
      %cst_49 = arith.constant 1.000000e+00 : f32
      %55 = vector.broadcast %cst_49 : f32 to vector<8x128xf32>
      %56 = arith.addf %54, %55 : vector<8x128xf32>
      %cst_50 = arith.constant 5.000000e-01 : f32
      %57 = vector.broadcast %cst_50 : f32 to vector<8x128xf32>
      %58 = arith.mulf %57, %56 : vector<8x128xf32>
      %59 = vector.extract_strided_slice %42 {offsets = [0, 256], sizes = [8, 128], strides = [1, 1]} : vector<8x512xf32> to vector<8x128xf32>
      %60 = math.tanh %59 : vector<8x128xf32>
      %61 = vector.extract_strided_slice %42 {offsets = [0, 384], sizes = [8, 128], strides = [1, 1]} : vector<8x512xf32> to vector<8x128xf32>
      %cst_51 = arith.constant 5.000000e-01 : f32
      %62 = vector.broadcast %cst_51 : f32 to vector<8x128xf32>
      %63 = arith.mulf %62, %61 : vector<8x128xf32>
      %64 = math.tanh %63 : vector<8x128xf32>
      %cst_52 = arith.constant 1.000000e+00 : f32
      %65 = vector.broadcast %cst_52 : f32 to vector<8x128xf32>
      %66 = arith.addf %64, %65 : vector<8x128xf32>
      %cst_53 = arith.constant 5.000000e-01 : f32
      %67 = vector.broadcast %cst_53 : f32 to vector<8x128xf32>
      %68 = arith.mulf %67, %66 : vector<8x128xf32>
      %69 = arith.mulf %58, %arg22 : vector<8x128xf32>
      %70 = arith.mulf %50, %60 : vector<8x128xf32>
      %71 = arith.addf %69, %70 : vector<8x128xf32>
      %72 = math.tanh %71 : vector<8x128xf32>
      %73 = arith.mulf %68, %72 : vector<8x128xf32>
      %74 = arith.index_cast %35 : i32 to index
      %c0_54 = arith.constant 0 : index
      %c0_55 = arith.constant 0 : index
      %75 = vector.load %arg17[%74, %c0_54, %c0_55] : memref<8x8x128xf32, #tpu.memory_space<vmem>>, vector<1x8x128xf32>
      %76 = vector.shape_cast %75 : vector<1x8x128xf32> to vector<8x128xf32>
      %c0_56 = arith.constant 0 : index
      %c0_57 = arith.constant 0 : index
      %77 = vector.load %arg8[%c0_56, %c0_57] : memref<128x8xf32, #tpu.memory_space<vmem>>, vector<128x8xf32>
      %cst_58 = arith.constant dense<0.000000e+00> : vector<8x8xf32>
      %78 = tpu.matmul %76, %77, %cst_58 {dimension_numbers = #tpu.dot_dimension_numbers<[1], [0], [0], [1], [0, 0, 1, 1], [], []>} : vector<8x128xf32>, vector<128x8xf32>, vector<8x8xf32> -> vector<8x8xf32>
      %c0_59 = arith.constant 0 : index
      %c0_60 = arith.constant 0 : index
      %79 = vector.load %arg9[%c0_59, %c0_60] : memref<128x8xf32, #tpu.memory_space<vmem>>, vector<128x8xf32>
      %cst_61 = arith.constant dense<0.000000e+00> : vector<8x8xf32>
      %80 = tpu.matmul %73, %79, %cst_61 {dimension_numbers = #tpu.dot_dimension_numbers<[1], [0], [0], [1], [0, 0, 1, 1], [], []>} : vector<8x128xf32>, vector<128x8xf32>, vector<8x8xf32> -> vector<8x8xf32>
      %81 = arith.addf %78, %80 : vector<8x8xf32>
      %c0_62 = arith.constant 0 : index
      %c0_63 = arith.constant 0 : index
      %82 = vector.load %arg10[%c0_62, %c0_63] : memref<1x8xf32, #tpu.memory_space<vmem>>, vector<1x8xf32>
      %83 = vector.broadcast %82 : vector<1x8xf32> to vector<8x8xf32>
      %84 = arith.addf %81, %83 : vector<8x8xf32>
      %85 = arith.index_cast %35 : i32 to index
      %c0_64 = arith.constant 0 : index
      %c0_65 = arith.constant 0 : index
      %86 = vector.load %arg16[%85, %c0_64, %c0_65] : memref<8x8x8xf32, #tpu.memory_space<vmem>>, vector<1x8x8xf32>
      %87 = vector.shape_cast %86 : vector<1x8x8xf32> to vector<8x8xf32>
      %88 = vector.shape_cast %84 : vector<8x8xf32> to vector<1x8x8xf32>
      tpu.vector_store %arg16[%85, %c0_64, %c0_65], %88 {strides = array<i32>} : memref<8x8x8xf32, #tpu.memory_space<vmem>>, vector<1x8x8xf32>,
      scf.yield %73, %71 : vector<8x128xf32>, vector<8x128xf32>
    }
    %c8_i32_20 = arith.constant 8 : i32
    %c0_21 = arith.constant 0 : index
    %c0_22 = arith.constant 0 : index
    %19 = vector.load %arg13[%c0_21, %c0_22] : memref<8x8xf32, #tpu.memory_space<vmem>>, vector<8x8xf32>
    %c0_i32_23 = arith.constant 0 : i32
    %20 = vector.broadcast %c0_i32_23 : i32 to vector<8x8xi32>
    %c0_24 = arith.constant 0 : index
    %c0_25 = arith.constant 0 : index
    %c0_26 = arith.constant 0 : index
    %21 = vector.load %arg15[%c0_24, %c0_25, %c0_26] : memref<8x8x8xi32, #tpu.memory_space<vmem>>, vector<1x8x8xi32>
    %22 = vector.shape_cast %21 : vector<1x8x8xi32> to vector<8x8xi32>
    %23 = vector.shape_cast %20 : vector<8x8xi32> to vector<1x8x8xi32>
    tpu.vector_store %arg15[%c0_24, %c0_25, %c0_26], %23 {strides = array<i32>} : memref<8x8x8xi32, #tpu.memory_space<vmem>>, vector<1x8x8xi32>,
    %c0_27 = arith.constant 0 : index
    %c0_28 = arith.constant 0 : index
    %24 = vector.load %arg11[%c0_27, %c0_28] : memref<1x8xf32, #tpu.memory_space<vmem>>, vector<1x8xf32>
    %c0_29 = arith.constant 0 : index
    %c0_30 = arith.constant 0 : index
    %c0_31 = arith.constant 0 : index
    %25 = vector.load %arg16[%c0_29, %c0_30, %c0_31] : memref<8x8x8xf32, #tpu.memory_space<vmem>>, vector<1x8x8xf32>
    %26 = vector.shape_cast %25 : vector<1x8x8xf32> to vector<8x8xf32>
    %27 = vector.broadcast %24 : vector<1x8xf32> to vector<8x8xf32>
    %28 = arith.addf %27, %26 : vector<8x8xf32>
    %c1_i32_32 = arith.constant 1 : i32
    %c7_i32 = arith.constant 7 : i32
    %29 = arith.addi %c1_i32_32, %c7_i32 : i32
    %c1_i32_33 = arith.constant 1 : i32
    %30 = scf.for %arg20 = %c1_i32_32 to %29 step %c1_i32_33 iter_args(%arg21 = %28) -> (vector<8x8xf32>)  : i32 {
      %35 = vector.shape_cast %arg21 : vector<8x8xf32> to vector<8x1x8xf32>
      %36 = vector.shape_cast %19 : vector<8x8xf32> to vector<1x8x8xf32>
      %37 = vector.broadcast %35 : vector<8x1x8xf32> to vector<8x8x8xf32>
      %38 = vector.broadcast %36 : vector<1x8x8xf32> to vector<8x8x8xf32>
      %39 = arith.addf %37, %38 : vector<8x8x8xf32>
      %cst_39 = arith.constant dense<0xFF800000> : vector<8x8xf32>
      %40 = vector.multi_reduction <maximumf>, %39, %cst_39 [2] : vector<8x8x8xf32> to vector<8x8xf32>
      %41 = vector.shape_cast %40 : vector<8x8xf32> to vector<8x8x1xf32>
      %42 = tpu.iota {dimensions = array<i32: 2>} : vector<8x8x8xi32>
      %43 = vector.broadcast %41 : vector<8x8x1xf32> to vector<8x8x8xf32>
      %44 = arith.cmpf oeq, %39, %43 : vector<8x8x8xf32>
      %c8_i32_40 = arith.constant 8 : i32
      %45 = vector.broadcast %c8_i32_40 : i32 to vector<8x8x8xi32>
      %46 = arith.select %44, %42, %45 : vector<8x8x8xi1>, vector<8x8x8xi32>
      %cst_41 = arith.constant dense<2147483647> : vector<8x8xi32>
      %47 = vector.multi_reduction <minsi>, %46, %cst_41 [2] : vector<8x8x8xi32> to vector<8x8xi32>
      %48 = arith.index_cast %arg20 : i32 to index
      %c0_42 = arith.constant 0 : index
      %c0_43 = arith.constant 0 : index
      %49 = vector.load %arg15[%48, %c0_42, %c0_43] : memref<8x8x8xi32, #tpu.memory_space<vmem>>, vector<1x8x8xi32>
      %50 = vector.shape_cast %49 : vector<1x8x8xi32> to vector<8x8xi32>
      %51 = vector.shape_cast %47 : vector<8x8xi32> to vector<1x8x8xi32>
      tpu.vector_store %arg15[%48, %c0_42, %c0_43], %51 {strides = array<i32>} : memref<8x8x8xi32, #tpu.memory_space<vmem>>, vector<1x8x8xi32>,
      %52 = vector.shape_cast %41 : vector<8x8x1xf32> to vector<8x8xf32>
      %53 = arith.index_cast %arg20 : i32 to index
      %c0_44 = arith.constant 0 : index
      %c0_45 = arith.constant 0 : index
      %54 = vector.load %arg16[%53, %c0_44, %c0_45] : memref<8x8x8xf32, #tpu.memory_space<vmem>>, vector<1x8x8xf32>
      %55 = vector.shape_cast %54 : vector<1x8x8xf32> to vector<8x8xf32>
      %56 = arith.addf %52, %55 : vector<8x8xf32>
      scf.yield %56 : vector<8x8xf32>
    }
    %c7_i32_34 = arith.constant 7 : i32
    %c0_35 = arith.constant 0 : index
    %c0_36 = arith.constant 0 : index
    %31 = vector.load %arg12[%c0_35, %c0_36] : memref<1x8xf32, #tpu.memory_space<vmem>>, vector<1x8xf32>
    %32 = vector.broadcast %31 : vector<1x8xf32> to vector<8x8xf32>
    %33 = arith.addf %30, %32 : vector<8x8xf32>
    %c0_37 = arith.constant 0 : index
    %c0_38 = arith.constant 0 : index
    %34 = vector.load %arg14[%c0_37, %c0_38] : memref<8x8xf32, #tpu.memory_space<vmem>>, vector<8x8xf32>
    tpu.vector_store %arg14[%c0_37, %c0_38], %33 {strides = array<i32>} : memref<8x8xf32, #tpu.memory_space<vmem>>, vector<8x8xf32>,
    return
  }
  func.func @transform_0(%arg0: i32) -> (i32, i32, i32) {
    %c0_i32 = arith.constant 0 : i32
    %c0_i32_0 = arith.constant 0 : i32
    %c0_i32_1 = arith.constant 0 : i32
    return %c0_i32, %arg0, %c0_i32_0 : i32, i32, i32
  }
  func.func @transform_1(%arg0: i32) -> (i32, i32) {
    %c0_i32 = arith.constant 0 : i32
    %c0_i32_0 = arith.constant 0 : i32
    %c0_i32_1 = arith.constant 0 : i32
    return %c0_i32, %c0_i32_0 : i32, i32
  }
  func.func @transform_2(%arg0: i32) -> (i32, i32) {
    %c0_i32 = arith.constant 0 : i32
    %c0_i32_0 = arith.constant 0 : i32
    %c0_i32_1 = arith.constant 0 : i32
    return %c0_i32, %c0_i32_0 : i32, i32
  }
  func.func @transform_3(%arg0: i32) -> (i32, i32) {
    %c0_i32 = arith.constant 0 : i32
    %c0_i32_0 = arith.constant 0 : i32
    %c0_i32_1 = arith.constant 0 : i32
    return %c0_i32, %c0_i32_0 : i32, i32
  }
  func.func @transform_4(%arg0: i32) -> (i32, i32) {
    %c0_i32 = arith.constant 0 : i32
    %c0_i32_0 = arith.constant 0 : i32
    %c0_i32_1 = arith.constant 0 : i32
    return %c0_i32, %c0_i32_0 : i32, i32
  }
  func.func @transform_5(%arg0: i32) -> (i32, i32) {
    %c0_i32 = arith.constant 0 : i32
    %c0_i32_0 = arith.constant 0 : i32
    %c0_i32_1 = arith.constant 0 : i32
    return %c0_i32, %c0_i32_0 : i32, i32
  }
  func.func @transform_6(%arg0: i32) -> (i32, i32) {
    %c0_i32 = arith.constant 0 : i32
    %c0_i32_0 = arith.constant 0 : i32
    %c0_i32_1 = arith.constant 0 : i32
    return %c0_i32, %c0_i32_0 : i32, i32
  }
  func.func @transform_7(%arg0: i32) -> (i32, i32) {
    %c0_i32 = arith.constant 0 : i32
    %c0_i32_0 = arith.constant 0 : i32
    %c0_i32_1 = arith.constant 0 : i32
    return %c0_i32, %c0_i32_0 : i32, i32
  }
  func.func @transform_8(%arg0: i32) -> (i32, i32) {
    %c0_i32 = arith.constant 0 : i32
    %c0_i32_0 = arith.constant 0 : i32
    %c0_i32_1 = arith.constant 0 : i32
    return %c0_i32, %c0_i32_0 : i32, i32
  }
  func.func @transform_9(%arg0: i32) -> (i32, i32) {
    %c0_i32 = arith.constant 0 : i32
    %c0_i32_0 = arith.constant 0 : i32
    %c0_i32_1 = arith.constant 0 : i32
    return %c0_i32, %c0_i32_0 : i32, i32
  }
  func.func @transform_10(%arg0: i32) -> (i32, i32) {
    %c0_i32 = arith.constant 0 : i32
    %c0_i32_0 = arith.constant 0 : i32
    %c0_i32_1 = arith.constant 0 : i32
    return %c0_i32, %c0_i32_0 : i32, i32
  }
  func.func @transform_11(%arg0: i32) -> (i32, i32) {
    %c0_i32 = arith.constant 0 : i32
    %c0_i32_0 = arith.constant 0 : i32
    %c0_i32_1 = arith.constant 0 : i32
    return %c0_i32, %c0_i32_0 : i32, i32
  }
  func.func @transform_12(%arg0: i32) -> (i32, i32) {
    %c0_i32 = arith.constant 0 : i32
    %c0_i32_0 = arith.constant 0 : i32
    %c0_i32_1 = arith.constant 0 : i32
    return %c0_i32, %c0_i32_0 : i32, i32
  }
  func.func @transform_13(%arg0: i32) -> (i32, i32) {
    %c0_i32 = arith.constant 0 : i32
    %c0_i32_0 = arith.constant 0 : i32
    return %arg0, %c0_i32 : i32, i32
  }
  func.func @transform_14(%arg0: i32) -> (i32, i32, i32) {
    %c0_i32 = arith.constant 0 : i32
    %c0_i32_0 = arith.constant 0 : i32
    %c0_i32_1 = arith.constant 0 : i32
    return %c0_i32, %arg0, %c0_i32_0 : i32, i32, i32
  }
}

</mosaic_0001>

<bundles_post_ra>
// kernel: tpu_custom_call.1
= control target key start
LH: loop header
LB: loop body
LE: loop exit
PB: predicated region body
PF: predicated region fallthrough
CT: control target
= control target key end

     0   :  { %20 = vsyncpa [#allocation7], 0  ;;  %s2534_s0 = inlined_call_operand.vmem [shape: f32[8,8,128], index: 0, kind: input, shape index: {}]   ;;  %s2535_s1 = inlined_call_operand.hbm [shape: f32[128,512], index: 1, kind: input, shape index: {}]   ;;  %s2536_s2 = inlined_call_operand.hbm [shape: f32[128,512], index: 2, kind: input, shape index: {}]   ;;  %s2537_s3 = inlined_call_operand.vmem [shape: f32[1,512], index: 3, kind: input, shape index: {}]   ;;  %s2538_s4 = inlined_call_operand.hbm [shape: f32[128,512], index: 4, kind: input, shape index: {}]   ;;  %s2539_s5 = inlined_call_operand.hbm [shape: f32[128,512], index: 5, kind: input, shape index: {}]   ;;  %s2540_s6 = inlined_call_operand.vmem [shape: f32[1,512], index: 6, kind: input, shape index: {}]   ;;  %s2541_s7 = inlined_call_operand.vmem [shape: f32[128,8], index: 7, kind: input, shape index: {}]   ;;  %s2542_s8 = inlined_call_operand.vmem [shape: f32[128,8], index: 8, kind: input, shape index: {}]   ;;  %s2543_s9 = inlined_call_operand.vmem [shape: f32[1,8], index: 9, kind: input, shape index: {}]   ;;  %s2544_s10 = inlined_call_operand.vmem [shape: f32[1,8], index: 10, kind: input, shape index: {}]   ;;  %s2545_s11 = inlined_call_operand.vmem [shape: f32[1,8], index: 11, kind: input, shape index: {}]   ;;  %s2546_s12 = inlined_call_operand.vmem [shape: f32[8,8], index: 12, kind: input, shape index: {}]   ;;  %s2547_s13 = inlined_call_operand.hbm [shape: f32[8,8], index: 13, kind: output, shape index: {0}]   ;;  %s2548_s14 = inlined_call_operand.hbm [shape: s32[8,8,8], index: 14, kind: output, shape index: {1}]  }
   0x1   :  { %21 = vsyncpa [#allocation10], 0 }
   0x2   :  { %22 = vsyncpa [#allocation13], 0 }
   0x3   :  { %23 = vsyncpa [#allocation8], 0 }
   0x4   :  { %24 = vsyncpa [#allocation16], 0  ;;  %s44_s15 = sshll.u32 %s2536_s2, 4  ;;  %s1889_s16 = smov [#allocation9]   ;;  %s45_s15 = int_to_ptr.hbm [resolvable:$true] %s44_s15 }
   0x5   :  { %s46_s17 = sshll.u32 %s1889_s16, 4  ;;  %s31_s20 = sshll.u32 %s2535_s1, 4  ;;  %s47_s17 = int_to_ptr.vmem [resolvable:$true] %s46_s17  ;;  %s32_s20 = int_to_ptr.hbm [resolvable:$true] %s31_s20 }
   0x6   :  { %s1890_s21 = smov 512   ;;  %s1891_s22 = smov 32  }
   0x7   :  { %52 = dma.hbm_to_vmem [thread:$0]  %s45_s15, 8192, %s47_s17, [#allocation10], %s1890_s21, %s1890_s21, %s1891_s22  }
   0x8   :  { %s1892_s23 = smov [#allocation6]   ;;  %s59_s27 = sshll.u32 %s2538_s4, 4  ;;  %s60_s27 = int_to_ptr.hbm [resolvable:$true] %s59_s27 }
   0x9   :  { %s33_s24 = sshll.u32 %s1892_s23, 4  ;;  %s72_s29 = sshll.u32 %s2539_s5, 4  ;;  %s34_s24 = int_to_ptr.vmem [resolvable:$true] %s33_s24  ;;  %s73_s29 = int_to_ptr.hbm [resolvable:$true] %s72_s29 }
   0xa   :  { %39 = dma.hbm_to_vmem [thread:$0]  %s32_s20, 8192, %s34_s24, [#allocation7], %s1890_s21, %s1890_s21, %s1891_s22  }
   0xb   :  { %s1893_s30 = smov [#allocation11]   ;;  %s1894_s1 = smov [#allocation12]  }
   0xc   :  { %s61_s16 = sshll.u32 %s1893_s30, 4  ;;  %s74_s15 = sshll.u32 %s1894_s1, 4  ;;  %s62_s16 = int_to_ptr.vmem [resolvable:$true] %s61_s16  ;;  %s75_s15 = int_to_ptr.vmem [resolvable:$true] %s74_s15 }
   0xd   :  { %67 = dma.hbm_to_vmem [thread:$0]  %s60_s27, 8192, %s62_s16, [#allocation10], %s1890_s21, %s1890_s21, %s1891_s22  }
   0xe   :  { %80 = dma.hbm_to_vmem [thread:$0]  %s73_s29, 8192, %s75_s15, [#allocation13], %s1890_s21, %s1890_s21, %s1891_s22  }
   0xf   :  { %1847 = dma.done.wait [#allocation7], 8192  }
  0x10   :  { %1848 = vsyncadd [#allocation7], 4294959104 }
  0x11   :  { %1849 = dma.done.wait [#allocation10], 16384  }
  0x12   :  { %1850 = vsyncadd [#allocation10], 4294950912 }
  0x13   :  { %1851 = dma.done.wait [#allocation13], 8192  }
  0x14   :  { %1852 = vsyncadd [#allocation13], 4294959104  ;;  %v181_v0 = vld [vmem:[#allocation6 + $0x1f0] sm:$0xff]  ;;  %v182_v1 = vld [vmem:[#allocation6 + $0x1f8] sm:$0xff] }
  0x15   :  { %v177_v2 = vld [vmem:[#allocation6 + $0x1d0] sm:$0xff]  ;;  %275 = vmatpush.msra.mxu2 %v181_v0  ;;  %316 = vmatpush.msra.mxu3 %v182_v1  ;;  %v178_v3 = vld [vmem:[#allocation6 + $0x1d8] sm:$0xff]  ;;  %v179_v6 = vld [vmem:[#allocation6 + $0x1e0] sm:$0xff] }
  0x16   :  { %v173_v4 = vld [vmem:[#allocation6 + $0x1b0] sm:$0xff]  ;;  %v174_v5 = vld [vmem:[#allocation6 + $0x1b8] sm:$0xff]  ;;  %v180_v7 = vld [vmem:[#allocation6 + $0x1e8] sm:$0xff]  ;;  %193 = vmatpush.msra.mxu0 %v179_v6 }
  0x17   :  { %276 = vmatpush.msra.mxu2 %v177_v2  ;;  %317 = vmatpush.msra.mxu3 %v178_v3  ;;  %v175_v8 = vld [vmem:[#allocation6 + $0x1c0] sm:$0xff]  ;;  %v176_v9 = vld [vmem:[#allocation6 + $0x1c8] sm:$0xff]  ;;  %v169_v10 = vld [vmem:[#allocation6 + $0x190] sm:$0xff] }
  0x18   :  { %234 = vmatpush.msra.mxu1 %v180_v7  ;;  %v170_v11 = vld [vmem:[#allocation6 + $0x198] sm:$0xff]  ;;  %v171_v12 = vld [vmem:[#allocation6 + $0x1a0] sm:$0xff]  ;;  %v172_v13 = vld [vmem:[#allocation6 + $0x1a8] sm:$0xff]  ;;  %194 = vmatpush.msra.mxu0 %v175_v8 }
  0x19   :  { %277 = vmatpush.msra.mxu2 %v173_v4  ;;  %318 = vmatpush.msra.mxu3 %v174_v5  ;;  %v165_v14 = vld [vmem:[#allocation6 + $0x170] sm:$0xff]  ;;  %v166_v15 = vld [vmem:[#allocation6 + $0x178] sm:$0xff]  ;;  %v167_v16 = vld [vmem:[#allocation6 + $0x180] sm:$0xff] }
  0x1a   :  { %235 = vmatpush.msra.mxu1 %v176_v9  ;;  %v168_v17 = vld [vmem:[#allocation6 + $0x188] sm:$0xff]  ;;  %195 = vmatpush.msra.mxu0 %v171_v12  ;;  %v161_v18 = vld [vmem:[#allocation6 + $0x150] sm:$0xff]  ;;  %v162_v19 = vld [vmem:[#allocation6 + $0x158] sm:$0xff] }
  0x1b   :  { %278 = vmatpush.msra.mxu2 %v169_v10  ;;  %319 = vmatpush.msra.mxu3 %v170_v11  ;;  %v163_v20 = vld [vmem:[#allocation6 + $0x160] sm:$0xff]  ;;  %v164_v21 = vld [vmem:[#allocation6 + $0x168] sm:$0xff]  ;;  %v157_v22 = vld [vmem:[#allocation6 + $0x130] sm:$0xff] }
  0x1c   :  { %236 = vmatpush.msra.mxu1 %v172_v13  ;;  %196 = vmatpush.msra.mxu0 %v167_v16  ;;  %v158_v23 = vld [vmem:[#allocation6 + $0x138] sm:$0xff]  ;;  %v159_v24 = vld [vmem:[#allocation6 + $0x140] sm:$0xff]  ;;  %v160_v25 = vld [vmem:[#allocation6 + $0x148] sm:$0xff] }
  0x1d   :  { %279 = vmatpush.msra.mxu2 %v165_v14  ;;  %320 = vmatpush.msra.mxu3 %v166_v15  ;;  %v153_v26 = vld [vmem:[#allocation6 + $0x110] sm:$0xff]  ;;  %v154_v27 = vld [vmem:[#allocation6 + $0x118] sm:$0xff]  ;;  %v155_v28 = vld [vmem:[#allocation6 + $0x120] sm:$0xff] }
  0x1e   :  { %237 = vmatpush.msra.mxu1 %v168_v17  ;;  %197 = vmatpush.msra.mxu0 %v163_v20  ;;  %v156_v29 = vld [vmem:[#allocation6 + $0x128] sm:$0xff]  ;;  %v149_v30 = vld [vmem:[#allocation6 + $0xf0] sm:$0xff]  ;;  %v150_v31 = vld [vmem:[#allocation6 + $0xf8] sm:$0xff] }
  0x1f   :  { %280 = vmatpush.msra.mxu2 %v161_v18  ;;  %321 = vmatpush.msra.mxu3 %v162_v19  ;;  %v151_v32 = vld [vmem:[#allocation6 + $0x100] sm:$0xff]  ;;  %v152_v33 = vld [vmem:[#allocation6 + $0x108] sm:$0xff]  ;;  %v145_v34 = vld [vmem:[#allocation6 + $0xd0] sm:$0xff] }
  0x20   :  { %238 = vmatpush.msra.mxu1 %v164_v21  ;;  %198 = vmatpush.msra.mxu0 %v159_v24  ;;  %v146_v35 = vld [vmem:[#allocation6 + $0xd8] sm:$0xff]  ;;  %v147_v36 = vld [vmem:[#allocation6 + $0xe0] sm:$0xff]  ;;  %v148_v37 = vld [vmem:[#allocation6 + $0xe8] sm:$0xff] }
  0x21   :  { %281 = vmatpush.msra.mxu2 %v157_v22  ;;  %322 = vmatpush.msra.mxu3 %v158_v23  ;;  %v141_v38 = vld [vmem:[#allocation6 + $0xb0] sm:$0xff]  ;;  %v142_v39 = vld [vmem:[#allocation6 + $0xb8] sm:$0xff]  ;;  %v143_v40 = vld [vmem:[#allocation6 + $0xc0] sm:$0xff] }
  0x22   :  { %239 = vmatpush.msra.mxu1 %v160_v25  ;;  %199 = vmatpush.msra.mxu0 %v155_v28  ;;  %v144_v41 = vld [vmem:[#allocation6 + $0xc8] sm:$0xff]  ;;  %v137_v42 = vld [vmem:[#allocation6 + $0x90] sm:$0xff]  ;;  %v138_v43 = vld [vmem:[#allocation6 + $0x98] sm:$0xff] }
  0x23   :  { %282 = vmatpush.msra.mxu2 %v153_v26  ;;  %323 = vmatpush.msra.mxu3 %v154_v27  ;;  %v139_v44 = vld [vmem:[#allocation6 + $0xa0] sm:$0xff]  ;;  %v140_v45 = vld [vmem:[#allocation6 + $0xa8] sm:$0xff]  ;;  %v133_v46 = vld [vmem:[#allocation6 + $0x70] sm:$0xff] }
  0x24   :  { %240 = vmatpush.msra.mxu1 %v156_v29  ;;  %200 = vmatpush.msra.mxu0 %v151_v32  ;;  %v134_v47 = vld [vmem:[#allocation6 + $0x78] sm:$0xff]  ;;  %v135_v48 = vld [vmem:[#allocation6 + $0x80] sm:$0xff]  ;;  %v136_v49 = vld [vmem:[#allocation6 + $0x88] sm:$0xff] }
  0x25   :  { %283 = vmatpush.msra.mxu2 %v149_v30  ;;  %324 = vmatpush.msra.mxu3 %v150_v31  ;;  %v129_v50 = vld [vmem:[#allocation6 + $0x50] sm:$0xff]  ;;  %v130_v51 = vld [vmem:[#allocation6 + $0x58] sm:$0xff]  ;;  %v131_v52 = vld [vmem:[#allocation6 + $0x60] sm:$0xff] }
  0x26   :  { %241 = vmatpush.msra.mxu1 %v152_v33  ;;  %201 = vmatpush.msra.mxu0 %v147_v36  ;;  %v132_v53 = vld [vmem:[#allocation6 + $0x68] sm:$0xff]  ;;  %v125_v54 = vld [vmem:[#allocation6 + $0x30] sm:$0xff]  ;;  %v126_v55 = vld [vmem:[#allocation6 + $0x38] sm:$0xff] }
  0x27   :  { %284 = vmatpush.msra.mxu2 %v145_v34  ;;  %325 = vmatpush.msra.mxu3 %v146_v35  ;;  %v127_v56 = vld [vmem:[#allocation6 + $0x40] sm:$0xff]  ;;  %v128_v57 = vld [vmem:[#allocation6 + $0x48] sm:$0xff]  ;;  %v121_v58 = vld [vmem:[#allocation6 + $0x10] sm:$0xff] }
  0x28   :  { %242 = vmatpush.msra.mxu1 %v148_v37  ;;  %202 = vmatpush.msra.mxu0 %v143_v40  ;;  %v122_v59 = vld [vmem:[#allocation6 + $0x18] sm:$0xff]  ;;  %v1991_v60 = vld [vmem:[%s2534_s0] sm:$0xff]  ;;  %v451_v61 = vld [vmem:[#allocation11 + $0x1f0] sm:$0xff] }
  0x29   :  { %285 = vmatpush.msra.mxu2 %v141_v38  ;;  %326 = vmatpush.msra.mxu3 %v142_v39  ;;  %v452_v62 = vld [vmem:[#allocation11 + $0x1f8] sm:$0xff]  ;;  %v123_v63 = vld [vmem:[#allocation6 + $0x20] sm:$0xff]  ;;  %v124_v0 = vld [vmem:[#allocation6 + $0x28] sm:$0xff] }
  0x2a   :  { %243 = vmatpush.msra.mxu1 %v144_v41  ;;  %203 = vmatpush.msra.mxu0 %v139_v44  ;;  %v447_v1 = vld [vmem:[#allocation11 + $0x1d0] sm:$0xff]  ;;  %v448_v2 = vld [vmem:[#allocation11 + $0x1d8] sm:$0xff]  ;;  %v119_v3 = vld [vmem:[#allocation6] sm:$0xff] }
  0x2b   :  { %286 = vmatpush.msra.mxu2 %v137_v42  ;;  %327 = vmatpush.msra.mxu3 %v138_v43  ;;  %v120_v4 = vld [vmem:[#allocation6 + $0x8] sm:$0xff]  ;;  %v449_v5 = vld [vmem:[#allocation11 + $0x1e0] sm:$0xff]  ;;  %v443_v7 = vld [vmem:[#allocation11 + $0x1b0] sm:$0xff] }
  0x2c   :  { %244 = vmatpush.msra.mxu1 %v140_v45  ;;  %204 = vmatpush.msra.mxu0 %v135_v48  ;;  %v450_v6 = vld [vmem:[#allocation11 + $0x1e8] sm:$0xff]  ;;  %v444_v8 = vld [vmem:[#allocation11 + $0x1b8] sm:$0xff]  ;;  %v445_v10 = vld [vmem:[#allocation11 + $0x1c0] sm:$0xff] }
  0x2d   :  { %287 = vmatpush.msra.mxu2 %v133_v46  ;;  %328 = vmatpush.msra.mxu3 %v134_v47  ;;  %v2000_v9 = vld [vmem:[%s2534_s0 + $0x8] sm:$0xff]  ;;  %v439_v12 = vld [vmem:[#allocation11 + $0x190] sm:$0xff]  ;;  %v440_v13 = vld [vmem:[#allocation11 + $0x198] sm:$0xff] }
  0x2e   :  { %245 = vmatpush.msra.mxu1 %v136_v49  ;;  %205 = vmatpush.msra.mxu0 %v131_v52  ;;  %v446_v11 = vld [vmem:[#allocation11 + $0x1c8] sm:$0xff]  ;;  %v441_v14 = vld [vmem:[#allocation11 + $0x1a0] sm:$0xff]  ;;  %v435_v16 = vld [vmem:[#allocation11 + $0x170] sm:$0xff] }
  0x2f   :  { %288 = vmatpush.msra.mxu2 %v129_v50  ;;  %329 = vmatpush.msra.mxu3 %v130_v51  ;;  %v442_v15 = vld [vmem:[#allocation11 + $0x1a8] sm:$0xff]  ;;  %v436_v17 = vld [vmem:[#allocation11 + $0x178] sm:$0xff]  ;;  %v437_v18 = vld [vmem:[#allocation11 + $0x180] sm:$0xff] }
  0x30   :  { %246 = vmatpush.msra.mxu1 %v132_v53  ;;  %206 = vmatpush.msra.mxu0 %v127_v56  ;;  %v438_v19 = vld [vmem:[#allocation11 + $0x188] sm:$0xff]  ;;  %v431_v20 = vld [vmem:[#allocation11 + $0x150] sm:$0xff]  ;;  %v432_v21 = vld [vmem:[#allocation11 + $0x158] sm:$0xff] }
  0x31   :  { %289 = vmatpush.msra.mxu2 %v125_v54  ;;  %330 = vmatpush.msra.mxu3 %v126_v55  ;;  %v2009_v22 = vld [vmem:[%s2534_s0 + $0x10] sm:$0xff]  ;;  %v433_v23 = vld [vmem:[#allocation11 + $0x160] sm:$0xff]  ;;  %v434_v24 = vld [vmem:[#allocation11 + $0x168] sm:$0xff] }
  0x32   :  { %247 = vmatpush.msra.mxu1 %v128_v57  ;;  %207 = vmatpush.msra.mxu0 %v123_v63  ;;  %v427_v25 = vld [vmem:[#allocation11 + $0x130] sm:$0xff]  ;;  %v428_v26 = vld [vmem:[#allocation11 + $0x138] sm:$0xff]  ;;  %v429_v27 = vld [vmem:[#allocation11 + $0x140] sm:$0xff] }
  0x33   :  { %290 = vmatpush.msra.mxu2 %v121_v58  ;;  %331 = vmatpush.msra.mxu3 %v122_v59  ;;  %v430_v28 = vld [vmem:[#allocation11 + $0x148] sm:$0xff]  ;;  %v423_v29 = vld [vmem:[#allocation11 + $0x110] sm:$0xff]  ;;  %v424_v30 = vld [vmem:[#allocation11 + $0x118] sm:$0xff] }
  0x34   :  { %291 = vmatmul.f32.vlgmr.msra.gmra.mxu2 %v1991_v60  ;;  %332 = vmatmul.f32.vlgmr.msra.gmra.mxu3 %v1991_v60  ;;  %v425_v31 = vld [vmem:[#allocation11 + $0x120] sm:$0xff]  ;;  %v426_v32 = vld [vmem:[#allocation11 + $0x128] sm:$0xff]  ;;  %v419_v33 = vld [vmem:[#allocation11 + $0xf0] sm:$0xff] }
  0x35   :  { %545 = vmatpush.msrb.mxu2 %v451_v61  ;;  %586 = vmatpush.msrb.mxu3 %v452_v62  ;;  %v420_v34 = vld [vmem:[#allocation11 + $0xf8] sm:$0xff]  ;;  %v421_v36 = vld [vmem:[#allocation11 + $0x100] sm:$0xff]  ;;  %v422_v37 = vld [vmem:[#allocation11 + $0x108] sm:$0xff] }
  0x36   :  { %248 = vmatpush.msra.mxu1 %v124_v0  ;;  %208 = vmatpush.msra.mxu0 %v119_v3  ;;  %v2018_v35 = vld [vmem:[%s2534_s0 + $0x18] sm:$0xff]  ;;  %v415_v38 = vld [vmem:[#allocation11 + $0xd0] sm:$0xff]  ;;  %v417_v40 = vld [vmem:[#allocation11 + $0xe0] sm:$0xff] }
  0x37   :  { %546 = vmatpush.msrb.mxu2 %v447_v1  ;;  %587 = vmatpush.msrb.mxu3 %v448_v2  ;;  %v416_v39 = vld [vmem:[#allocation11 + $0xd8] sm:$0xff]  ;;  %v418_v41 = vld [vmem:[#allocation11 + $0xe8] sm:$0xff]  ;;  %v411_v42 = vld [vmem:[#allocation11 + $0xb0] sm:$0xff] }
  0x38   :  { %249 = vmatpush.msra.mxu1 %v120_v4  ;;  %209 = vmatmul.f32.vlgmr.msra.gmra.mxu0 %v1991_v60  ;;  %v412_v43 = vld [vmem:[#allocation11 + $0xb8] sm:$0xff]  ;;  %v413_v44 = vld [vmem:[#allocation11 + $0xc0] sm:$0xff]  ;;  %v414_v45 = vld [vmem:[#allocation11 + $0xc8] sm:$0xff] }
  0x39   :  { %250 = vmatmul.f32.vlgmr.msra.gmra.mxu1 %v1991_v60  ;;  %463 = vmatpush.msrb.mxu0 %v449_v5  ;;  %v407_v46 = vld [vmem:[#allocation11 + $0x90] sm:$0xff]  ;;  %v408_v47 = vld [vmem:[#allocation11 + $0x98] sm:$0xff]  ;;  %v2027_v48 = vld [vmem:[%s2534_s0 + $0x20] sm:$0xff] }
  0x3a   :  { %504 = vmatpush.msrb.mxu1 %v450_v6  ;;  %547 = vmatpush.msrb.mxu2 %v443_v7  ;;  %v409_v49 = vld [vmem:[#allocation11 + $0xa0] sm:$0xff]  ;;  %v410_v50 = vld [vmem:[#allocation11 + $0xa8] sm:$0xff]  ;;  %v403_v51 = vld [vmem:[#allocation11 + $0x70] sm:$0xff] }
  0x3b   :  { %588 = vmatpush.msrb.mxu3 %v444_v8  ;;  %464 = vmatpush.msrb.mxu0 %v445_v10  ;;  %v404_v52 = vld [vmem:[#allocation11 + $0x78] sm:$0xff]  ;;  %v405_v53 = vld [vmem:[#allocation11 + $0x80] sm:$0xff]  ;;  %v406_v54 = vld [vmem:[#allocation11 + $0x88] sm:$0xff] }
  0x3c   :  { %294 = vmatmul.f32.gmra.mxu2 %v2000_v9  ;;  %335 = vmatmul.f32.gmra.mxu3 %v2000_v9  ;;  %v399_v55 = vld [vmem:[#allocation11 + $0x50] sm:$0xff]  ;;  %v400_v56 = vld [vmem:[#allocation11 + $0x58] sm:$0xff]  ;;  %v401_v57 = vld [vmem:[#allocation11 + $0x60] sm:$0xff] }
  0x3d   :  { %505 = vmatpush.msrb.mxu1 %v446_v11  ;;  %548 = vmatpush.msrb.mxu2 %v439_v12  ;;  %v402_v58 = vld [vmem:[#allocation11 + $0x68] sm:$0xff]  ;;  %v395_v59 = vld [vmem:[#allocation11 + $0x30] sm:$0xff]  ;;  %v396_v61 = vld [vmem:[#allocation11 + $0x38] sm:$0xff] }
  0x3e   :  { %589 = vmatpush.msrb.mxu3 %v440_v13  ;;  %465 = vmatpush.msrb.mxu0 %v441_v14  ;;  %v116_v62 = vld [vmem:[%s2534_s0 + $0x28] sm:$0xff]  ;;  %v397_v63 = vld [vmem:[#allocation11 + $0x40] sm:$0xff]  ;;  %v391_v1 = vld [vmem:[#allocation11 + $0x10] sm:$0xff] }
  0x3f   :  { %506 = vmatpush.msrb.mxu1 %v442_v15  ;;  %549 = vmatpush.msrb.mxu2 %v435_v16  ;;  %v398_v0 = vld [vmem:[#allocation11 + $0x48] sm:$0xff]  ;;  %v392_v2 = vld [vmem:[#allocation11 + $0x18] sm:$0xff]  ;;  %v393_v3 = vld [vmem:[#allocation11 + $0x20] sm:$0xff] }
  0x40   :  { %590 = vmatpush.msrb.mxu3 %v436_v17  ;;  %212 = vmatmul.f32.gmra.mxu0 %v2000_v9  ;;  %v394_v4 = vld [vmem:[#allocation11 + $0x28] sm:$0xff]  ;;  %v389_v5 = vld [vmem:[#allocation11] sm:$0xff]  ;;  %v117_v7 = vld [vmem:[%s2534_s0 + $0x30] sm:$0xff] }
  0x41   :  { %253 = vmatmul.f32.gmra.mxu1 %v2000_v9  ;;  %466 = vmatpush.msrb.mxu0 %v437_v18  ;;  %v390_v6 = vld [vmem:[#allocation11 + $0x8] sm:$0xff]  ;;  %v118_v8 = vld [vmem:[%s2534_s0 + $0x38] sm:$0xff] }
  0x42   :  { %507 = vmatpush.msrb.mxu1 %v438_v19  ;;  %550 = vmatpush.msrb.mxu2 %v431_v20 }
  0x43   :  { %591 = vmatpush.msrb.mxu3 %v432_v21  ;;  %467 = vmatpush.msrb.mxu0 %v433_v23 }
  0x44   :  { %297 = vmatmul.f32.gmra.mxu2 %v2009_v22  ;;  %338 = vmatmul.f32.gmra.mxu3 %v2009_v22 }
  0x45   :  { %508 = vmatpush.msrb.mxu1 %v434_v24  ;;  %551 = vmatpush.msrb.mxu2 %v427_v25 }
  0x46   :  { %592 = vmatpush.msrb.mxu3 %v428_v26  ;;  %468 = vmatpush.msrb.mxu0 %v429_v27 }
  0x47   :  { %509 = vmatpush.msrb.mxu1 %v430_v28  ;;  %552 = vmatpush.msrb.mxu2 %v423_v29 }
  0x48   :  { %593 = vmatpush.msrb.mxu3 %v424_v30  ;;  %215 = vmatmul.f32.gmra.mxu0 %v2009_v22 }
  0x49   :  { %256 = vmatmul.f32.gmra.mxu1 %v2009_v22  ;;  %469 = vmatpush.msrb.mxu0 %v425_v31 }
  0x4a   :  { %510 = vmatpush.msrb.mxu1 %v426_v32  ;;  %553 = vmatpush.msrb.mxu2 %v419_v33 }
  0x4b   :  { %594 = vmatpush.msrb.mxu3 %v420_v34  ;;  %470 = vmatpush.msrb.mxu0 %v421_v36 }
  0x4c   :  { %300 = vmatmul.f32.gmra.mxu2 %v2018_v35  ;;  %341 = vmatmul.f32.gmra.mxu3 %v2018_v35 }
  0x4d   :  { %511 = vmatpush.msrb.mxu1 %v422_v37  ;;  %554 = vmatpush.msrb.mxu2 %v415_v38 }
  0x4e   :  { %595 = vmatpush.msrb.mxu3 %v416_v39  ;;  %471 = vmatpush.msrb.mxu0 %v417_v40 }
  0x4f   :  { %512 = vmatpush.msrb.mxu1 %v418_v41  ;;  %555 = vmatpush.msrb.mxu2 %v411_v42 }
  0x50   :  { %596 = vmatpush.msrb.mxu3 %v412_v43  ;;  %218 = vmatmul.f32.gmra.mxu0 %v2018_v35 }
  0x51   :  { %259 = vmatmul.f32.gmra.mxu1 %v2018_v35  ;;  %472 = vmatpush.msrb.mxu0 %v413_v44 }
  0x52   :  { %513 = vmatpush.msrb.mxu1 %v414_v45  ;;  %556 = vmatpush.msrb.mxu2 %v407_v46 }
  0x53   :  { %597 = vmatpush.msrb.mxu3 %v408_v47  ;;  %473 = vmatpush.msrb.mxu0 %v409_v49 }
  0x54   :  { %303 = vmatmul.f32.gmra.mxu2 %v2027_v48  ;;  %344 = vmatmul.f32.gmra.mxu3 %v2027_v48 }
  0x55   :  { %514 = vmatpush.msrb.mxu1 %v410_v50  ;;  %557 = vmatpush.msrb.mxu2 %v403_v51 }
  0x56   :  { %598 = vmatpush.msrb.mxu3 %v404_v52  ;;  %474 = vmatpush.msrb.mxu0 %v405_v53 }
  0x57   :  { %515 = vmatpush.msrb.mxu1 %v406_v54  ;;  %558 = vmatpush.msrb.mxu2 %v399_v55 }
  0x58   :  { %599 = vmatpush.msrb.mxu3 %v400_v56  ;;  %221 = vmatmul.f32.gmra.mxu0 %v2027_v48 }
  0x59   :  { %262 = vmatmul.f32.gmra.mxu1 %v2027_v48  ;;  %475 = vmatpush.msrb.mxu0 %v401_v57 }
  0x5a   :  { %516 = vmatpush.msrb.mxu1 %v402_v58  ;;  %559 = vmatpush.msrb.mxu2 %v395_v59 }
  0x5b   :  { %600 = vmatpush.msrb.mxu3 %v396_v61  ;;  %476 = vmatpush.msrb.mxu0 %v397_v63 }
  0x5c   :  { %306 = vmatmul.f32.gmra.mxu2 %v116_v62  ;;  %347 = vmatmul.f32.gmra.mxu3 %v116_v62 }
  0x5d   :  { %517 = vmatpush.msrb.mxu1 %v398_v0  ;;  %560 = vmatpush.msrb.mxu2 %v391_v1 }
  0x5e   :  { %601 = vmatpush.msrb.mxu3 %v392_v2  ;;  %477 = vmatpush.msrb.mxu0 %v393_v3 }
  0x5f   :  { %518 = vmatpush.msrb.mxu1 %v394_v4 }
  0x60   :  { %224 = vmatmul.f32.gmra.mxu0 %v116_v62 }
  0x61   :  { %265 = vmatmul.f32.gmra.mxu1 %v116_v62  ;;  %478 = vmatpush.msrb.mxu0 %v389_v5 }
  0x62   :  { %519 = vmatpush.msrb.mxu1 %v390_v6 }
  0x64   :  { %309 = vmatmul.f32.gmra.mxu2 %v117_v7  ;;  %350 = vmatmul.f32.gmra.mxu3 %v117_v7 }
  0x68   :  { %227 = vmatmul.f32.gmra.mxu0 %v117_v7 }
  0x69   :  { %268 = vmatmul.f32.gmra.mxu1 %v117_v7 }
  0x6c   :  { %312 = vmatmul.f32.gmra.mxu2 %v118_v8  ;;  %353 = vmatmul.f32.gmra.mxu3 %v118_v8 }
  0x70   :  { %230 = vmatmul.f32.gmra.mxu0 %v118_v8 }
  0x71   :  { %271 = vmatmul.f32.gmra.mxu1 %v118_v8 }
  0x74   :  { %561 = vmatmul.f32.vlgmr.msrb.gmra.mxu2 %v1991_v60  ;;  %602 = vmatmul.f32.vlgmr.msrb.gmra.mxu3 %v1991_v60 }
  0x78   :  { %479 = vmatmul.f32.vlgmr.msrb.gmra.mxu0 %v1991_v60 }
  0x79   :  { %520 = vmatmul.f32.vlgmr.msrb.gmra.mxu1 %v1991_v60  ;;  %v183_v60 = vld [vmem:[%s2537_s3] sm:$0xf] }
  0x7a   :  { %v2067_v10 = vperm.slane %v183_v60, 1  ;;  %v2069_v11 = vperm.slane %v183_v60, 2  ;;  %v2071_v12 = vperm.slane %v183_v60, 3 }
  0x7c   :  { %564 = vmatmul.f32.gmra.mxu2 %v2000_v9  ;;  %605 = vmatmul.f32.gmra.mxu3 %v2000_v9 }
  0x80   :  { %482 = vmatmul.f32.gmra.mxu0 %v2000_v9 }
  0x81   :  { %523 = vmatmul.f32.gmra.mxu1 %v2000_v9  ;;  %v2065_v9 = vperm.slane %v183_v60, 0 }
  0x84   :  { %567 = vmatmul.f32.gmra.mxu2 %v2009_v22  ;;  %608 = vmatmul.f32.gmra.mxu3 %v2009_v22 }
  0x88   :  { %485 = vmatmul.f32.gmra.mxu0 %v2009_v22 }
  0x89   :  { %526 = vmatmul.f32.gmra.mxu1 %v2009_v22 }
  0x8c   :  { %570 = vmatmul.f32.gmra.mxu2 %v2018_v35  ;;  %611 = vmatmul.f32.gmra.mxu3 %v2018_v35 }
  0x90   :  { %488 = vmatmul.f32.gmra.mxu0 %v2018_v35 }
  0x91   :  { %529 = vmatmul.f32.gmra.mxu1 %v2018_v35 }
  0x94   :  { %573 = vmatmul.f32.gmra.mxu2 %v2027_v48  ;;  %614 = vmatmul.f32.gmra.mxu3 %v2027_v48 }
  0x98   :  { %491 = vmatmul.f32.gmra.mxu0 %v2027_v48 }
  0x99   :  { %532 = vmatmul.f32.gmra.mxu1 %v2027_v48 }
  0x9c   :  { %576 = vmatmul.f32.gmra.mxu2 %v116_v62  ;;  %617 = vmatmul.f32.gmra.mxu3 %v116_v62 }
  0xa0   :  { %494 = vmatmul.f32.gmra.mxu0 %v116_v62 }
  0xa1   :  { %535 = vmatmul.f32.gmra.mxu1 %v116_v62 }
  0xa4   :  { %579 = vmatmul.f32.gmra.mxu2 %v117_v7  ;;  %620 = vmatmul.f32.gmra.mxu3 %v117_v7 }
  0xa8   :  { %497 = vmatmul.f32.gmra.mxu0 %v117_v7 }
  0xa9   :  { %538 = vmatmul.f32.gmra.mxu1 %v117_v7 }
  0xac   :  { %582 = vmatmul.f32.gmra.mxu2 %v118_v8  ;;  %623 = vmatmul.f32.gmra.mxu3 %v118_v8 }
  0xb0   :  { %500 = vmatmul.f32.gmra.mxu0 %v118_v8 }
  0xb1   :  { %541 = vmatmul.f32.gmra.mxu1 %v118_v8 }
  0xb5   :  { %v210_v13 = vpop.f32.mrf.mxu0 }
  0xb6   :  { %v251_v14 = vpop.f32.mrf.mxu1  ;;  %v211_v15 = vadd.f32 %v210_v13, %v2065_v9 }
  0xb7   :  { %v252_v16 = vadd.f32 %v251_v14, %v2067_v10  ;;  %v292_v17 = vpop.f32.mrf.mxu2  ;;  %v333_v18 = vpop.f32.mrf.mxu3 }
  0xb8   :  { %v293_v19 = vadd.f32 %v292_v17, %v2069_v11  ;;  %v334_v20 = vadd.f32 %v333_v18, %v2071_v12  ;;  %357 = vst [vmem:[#allocation4] sm:$0xff] %v211_v15  ;;  %v453_v17 = vld [vmem:[%s2540_s6] sm:$0xf]  ;;  %s2152_s6 = smov 0  }
  0xb9   :  { %358 = vst [vmem:[#allocation4 + $0x8] sm:$0xff] %v252_v16  ;;  %v2108_v18 = vperm.slane %v453_v17, 0 }
  0xba   :  { %359 = vst [vmem:[#allocation4 + $0x10] sm:$0xff] %v293_v19  ;;  %v2110_v19 = vperm.slane %v453_v17, 1 }
  0xbb   :  { %360 = vst [vmem:[#allocation4 + $0x18] sm:$0xff] %v334_v20 }
  0xbd   :  { %v213_v21 = vpop.f32.mrf.mxu0 }
  0xbe   :  { %v254_v22 = vpop.f32.mrf.mxu1  ;;  %v214_v23 = vadd.f32 %v213_v21, %v2065_v9 }
  0xbf   :  { %v255_v24 = vadd.f32 %v254_v22, %v2067_v10  ;;  %v295_v25 = vpop.f32.mrf.mxu2  ;;  %v336_v26 = vpop.f32.mrf.mxu3 }
  0xc0   :  { %v296_v27 = vadd.f32 %v295_v25, %v2069_v11  ;;  %v337_v28 = vadd.f32 %v336_v26, %v2071_v12  ;;  %361 = vst [vmem:[#allocation4 + $0x20] sm:$0xff] %v214_v23 }
  0xc1   :  { %362 = vst [vmem:[#allocation4 + $0x28] sm:$0xff] %v255_v24 }
  0xc2   :  { %363 = vst [vmem:[#allocation4 + $0x30] sm:$0xff] %v296_v27 }
  0xc3   :  { %364 = vst [vmem:[#allocation4 + $0x38] sm:$0xff] %v337_v28 }
  0xc5   :  { %v216_v29 = vpop.f32.mrf.mxu0 }
  0xc6   :  { %v257_v30 = vpop.f32.mrf.mxu1  ;;  %v217_v31 = vadd.f32 %v216_v29, %v2065_v9 }
  0xc7   :  { %v258_v32 = vadd.f32 %v257_v30, %v2067_v10  ;;  %v298_v33 = vpop.f32.mrf.mxu2  ;;  %v339_v34 = vpop.f32.mrf.mxu3 }
  0xc8   :  { %v299_v35 = vadd.f32 %v298_v33, %v2069_v11  ;;  %v340_v36 = vadd.f32 %v339_v34, %v2071_v12  ;;  %365 = vst [vmem:[#allocation4 + $0x40] sm:$0xff] %v217_v31 }
  0xc9   :  { %366 = vst [vmem:[#allocation4 + $0x48] sm:$0xff] %v258_v32 }
  0xca   :  { %367 = vst [vmem:[#allocation4 + $0x50] sm:$0xff] %v299_v35 }
  0xcb   :  { %368 = vst [vmem:[#allocation4 + $0x58] sm:$0xff] %v340_v36 }
  0xcd   :  { %v219_v37 = vpop.f32.mrf.mxu0 }
  0xce   :  { %v260_v38 = vpop.f32.mrf.mxu1  ;;  %v220_v39 = vadd.f32 %v219_v37, %v2065_v9 }
  0xcf   :  { %v261_v40 = vadd.f32 %v260_v38, %v2067_v10  ;;  %v301_v41 = vpop.f32.mrf.mxu2  ;;  %v342_v42 = vpop.f32.mrf.mxu3 }
  0xd0   :  { %v302_v43 = vadd.f32 %v301_v41, %v2069_v11  ;;  %v343_v44 = vadd.f32 %v342_v42, %v2071_v12  ;;  %369 = vst [vmem:[#allocation4 + $0x60] sm:$0xff] %v220_v39 }
  0xd1   :  { %370 = vst [vmem:[#allocation4 + $0x68] sm:$0xff] %v261_v40 }
  0xd2   :  { %371 = vst [vmem:[#allocation4 + $0x70] sm:$0xff] %v302_v43 }
  0xd3   :  { %372 = vst [vmem:[#allocation4 + $0x78] sm:$0xff] %v343_v44 }
  0xd5   :  { %v222_v45 = vpop.f32.mrf.mxu0 }
  0xd6   :  { %v263_v46 = vpop.f32.mrf.mxu1  ;;  %v223_v47 = vadd.f32 %v222_v45, %v2065_v9 }
  0xd7   :  { %v264_v48 = vadd.f32 %v263_v46, %v2067_v10  ;;  %v304_v49 = vpop.f32.mrf.mxu2  ;;  %v345_v50 = vpop.f32.mrf.mxu3 }
  0xd8   :  { %v305_v51 = vadd.f32 %v304_v49, %v2069_v11  ;;  %v346_v52 = vadd.f32 %v345_v50, %v2071_v12  ;;  %373 = vst [vmem:[#allocation4 + $0x80] sm:$0xff] %v223_v47 }
  0xd9   :  { %374 = vst [vmem:[#allocation4 + $0x88] sm:$0xff] %v264_v48 }
  0xda   :  { %375 = vst [vmem:[#allocation4 + $0x90] sm:$0xff] %v305_v51 }
  0xdb   :  { %376 = vst [vmem:[#allocation4 + $0x98] sm:$0xff] %v346_v52 }
  0xdd   :  { %v225_v53 = vpop.f32.mrf.mxu0 }
  0xde   :  { %v266_v54 = vpop.f32.mrf.mxu1  ;;  %v226_v55 = vadd.f32 %v225_v53, %v2065_v9 }
  0xdf   :  { %v267_v56 = vadd.f32 %v266_v54, %v2067_v10  ;;  %v307_v57 = vpop.f32.mrf.mxu2  ;;  %v348_v58 = vpop.f32.mrf.mxu3 }
  0xe0   :  { %v308_v59 = vadd.f32 %v307_v57, %v2069_v11  ;;  %v349_v61 = vadd.f32 %v348_v58, %v2071_v12  ;;  %377 = vst [vmem:[#allocation4 + $0xa0] sm:$0xff] %v226_v55 }
  0xe1   :  { %378 = vst [vmem:[#allocation4 + $0xa8] sm:$0xff] %v267_v56 }
  0xe2   :  { %379 = vst [vmem:[#allocation4 + $0xb0] sm:$0xff] %v308_v59 }
  0xe3   :  { %380 = vst [vmem:[#allocation4 + $0xb8] sm:$0xff] %v349_v61 }
  0xe5   :  { %v228_v62 = vpop.f32.mrf.mxu0 }
  0xe6   :  { %v269_v63 = vpop.f32.mrf.mxu1  ;;  %v229_v0 = vadd.f32 %v228_v62, %v2065_v9 }
  0xe7   :  { %v270_v1 = vadd.f32 %v269_v63, %v2067_v10  ;;  %v310_v2 = vpop.f32.mrf.mxu2  ;;  %v351_v3 = vpop.f32.mrf.mxu3 }
  0xe8   :  { %v311_v4 = vadd.f32 %v310_v2, %v2069_v11  ;;  %v352_v5 = vadd.f32 %v351_v3, %v2071_v12  ;;  %381 = vst [vmem:[#allocation4 + $0xc0] sm:$0xff] %v229_v0 }
  0xe9   :  { %382 = vst [vmem:[#allocation4 + $0xc8] sm:$0xff] %v270_v1 }
  0xea   :  { %383 = vst [vmem:[#allocation4 + $0xd0] sm:$0xff] %v311_v4 }
  0xeb   :  { %384 = vst [vmem:[#allocation4 + $0xd8] sm:$0xff] %v352_v5 }
  0xed   :  { %v231_v6 = vpop.f32.mrf.mxu0 }
  0xee   :  { %v272_v7 = vpop.f32.mrf.mxu1  ;;  %v232_v8 = vadd.f32 %v231_v6, %v2065_v9  ;;  %v2112_v9 = vperm.slane %v453_v17, 2 }
  0xef   :  { %v273_v60 = vadd.f32 %v272_v7, %v2067_v10  ;;  %v313_v13 = vpop.f32.mrf.mxu2  ;;  %v354_v14 = vpop.f32.mrf.mxu3  ;;  %v2114_v10 = vperm.slane %v453_v17, 3 }
  0xf0   :  { %v314_v15 = vadd.f32 %v313_v13, %v2069_v11  ;;  %v355_v16 = vadd.f32 %v354_v14, %v2071_v12  ;;  %385 = vst [vmem:[#allocation4 + $0xe0] sm:$0xff] %v232_v8 }
  0xf1   :  { %386 = vst [vmem:[#allocation4 + $0xe8] sm:$0xff] %v273_v60 }
  0xf2   :  { %387 = vst [vmem:[#allocation4 + $0xf0] sm:$0xff] %v314_v15 }
  0xf3   :  { %388 = vst [vmem:[#allocation4 + $0xf8] sm:$0xff] %v355_v16 }
  0xf5   :  { %v480_v20 = vpop.f32.mrf.mxu0 }
  0xf6   :  { %v521_v11 = vpop.f32.mrf.mxu1  ;;  %v481_v12 = vadd.f32 %v480_v20, %v2108_v18 }
  0xf7   :  { %v522_v21 = vadd.f32 %v521_v11, %v2110_v19  ;;  %v562_v22 = vpop.f32.mrf.mxu2  ;;  %v603_v23 = vpop.f32.mrf.mxu3 }
  0xf8   :  { %v563_v24 = vadd.f32 %v562_v22, %v2112_v9  ;;  %v604_v25 = vadd.f32 %v603_v23, %v2114_v10  ;;  %627 = vst [vmem:[#allocation5] sm:$0xff] %v481_v12  ;;  %v2148_v22 = vmov 0.0   ;;  %v2150_v23 = vmov 0.0  }
  0xf9   :  { %628 = vst [vmem:[#allocation5 + $0x8] sm:$0xff] %v522_v21 }
  0xfa   :  { %629 = vst [vmem:[#allocation5 + $0x10] sm:$0xff] %v563_v24 }
  0xfb   :  { %630 = vst [vmem:[#allocation5 + $0x18] sm:$0xff] %v604_v25 }
  0xfd   :  { %v483_v26 = vpop.f32.mrf.mxu0 }
  0xfe   :  { %v524_v27 = vpop.f32.mrf.mxu1  ;;  %v484_v28 = vadd.f32 %v483_v26, %v2108_v18 }
  0xff   :  { %v525_v29 = vadd.f32 %v524_v27, %v2110_v19  ;;  %v565_v30 = vpop.f32.mrf.mxu2  ;;  %v606_v31 = vpop.f32.mrf.mxu3 }
 0x100   :  { %v566_v32 = vadd.f32 %v565_v30, %v2112_v9  ;;  %v607_v33 = vadd.f32 %v606_v31, %v2114_v10  ;;  %631 = vst [vmem:[#allocation5 + $0x20] sm:$0xff] %v484_v28 }
 0x101   :  { %632 = vst [vmem:[#allocation5 + $0x28] sm:$0xff] %v525_v29 }
 0x102   :  { %633 = vst [vmem:[#allocation5 + $0x30] sm:$0xff] %v566_v32 }
 0x103   :  { %634 = vst [vmem:[#allocation5 + $0x38] sm:$0xff] %v607_v33 }
 0x105   :  { %v486_v34 = vpop.f32.mrf.mxu0 }
 0x106   :  { %v527_v35 = vpop.f32.mrf.mxu1  ;;  %v487_v36 = vadd.f32 %v486_v34, %v2108_v18 }
 0x107   :  { %v528_v37 = vadd.f32 %v527_v35, %v2110_v19  ;;  %v568_v38 = vpop.f32.mrf.mxu2  ;;  %v609_v39 = vpop.f32.mrf.mxu3 }
 0x108   :  { %v569_v40 = vadd.f32 %v568_v38, %v2112_v9  ;;  %v610_v41 = vadd.f32 %v609_v39, %v2114_v10  ;;  %635 = vst [vmem:[#allocation5 + $0x40] sm:$0xff] %v487_v36 }
 0x109   :  { %636 = vst [vmem:[#allocation5 + $0x48] sm:$0xff] %v528_v37 }
 0x10a   :  { %637 = vst [vmem:[#allocation5 + $0x50] sm:$0xff] %v569_v40 }
 0x10b   :  { %638 = vst [vmem:[#allocation5 + $0x58] sm:$0xff] %v610_v41 }
 0x10d   :  { %v489_v42 = vpop.f32.mrf.mxu0 }
 0x10e   :  { %v530_v43 = vpop.f32.mrf.mxu1  ;;  %v490_v44 = vadd.f32 %v489_v42, %v2108_v18 }
 0x10f   :  { %v531_v45 = vadd.f32 %v530_v43, %v2110_v19  ;;  %v571_v46 = vpop.f32.mrf.mxu2  ;;  %v612_v47 = vpop.f32.mrf.mxu3 }
 0x110   :  { %v572_v48 = vadd.f32 %v571_v46, %v2112_v9  ;;  %v613_v49 = vadd.f32 %v612_v47, %v2114_v10  ;;  %639 = vst [vmem:[#allocation5 + $0x60] sm:$0xff] %v490_v44 }
 0x111   :  { %640 = vst [vmem:[#allocation5 + $0x68] sm:$0xff] %v531_v45 }
 0x112   :  { %641 = vst [vmem:[#allocation5 + $0x70] sm:$0xff] %v572_v48 }
 0x113   :  { %642 = vst [vmem:[#allocation5 + $0x78] sm:$0xff] %v613_v49 }
 0x115   :  { %v492_v50 = vpop.f32.mrf.mxu0 }
 0x116   :  { %v533_v51 = vpop.f32.mrf.mxu1  ;;  %v493_v52 = vadd.f32 %v492_v50, %v2108_v18 }
 0x117   :  { %v534_v53 = vadd.f32 %v533_v51, %v2110_v19  ;;  %v574_v54 = vpop.f32.mrf.mxu2  ;;  %v615_v55 = vpop.f32.mrf.mxu3 }
 0x118   :  { %v575_v56 = vadd.f32 %v574_v54, %v2112_v9  ;;  %v616_v57 = vadd.f32 %v615_v55, %v2114_v10  ;;  %643 = vst [vmem:[#allocation5 + $0x80] sm:$0xff] %v493_v52 }
 0x119   :  { %644 = vst [vmem:[#allocation5 + $0x88] sm:$0xff] %v534_v53 }
 0x11a   :  { %645 = vst [vmem:[#allocation5 + $0x90] sm:$0xff] %v575_v56 }
 0x11b   :  { %646 = vst [vmem:[#allocation5 + $0x98] sm:$0xff] %v616_v57 }
 0x11d   :  { %v495_v58 = vpop.f32.mrf.mxu0 }
 0x11e   :  { %v536_v59 = vpop.f32.mrf.mxu1  ;;  %v496_v61 = vadd.f32 %v495_v58, %v2108_v18 }
 0x11f   :  { %v537_v62 = vadd.f32 %v536_v59, %v2110_v19  ;;  %v577_v63 = vpop.f32.mrf.mxu2  ;;  %v618_v0 = vpop.f32.mrf.mxu3 }
 0x120   :  { %v578_v1 = vadd.f32 %v577_v63, %v2112_v9  ;;  %v619_v2 = vadd.f32 %v618_v0, %v2114_v10  ;;  %647 = vst [vmem:[#allocation5 + $0xa0] sm:$0xff] %v496_v61 }
 0x121   :  { %648 = vst [vmem:[#allocation5 + $0xa8] sm:$0xff] %v537_v62 }
 0x122   :  { %649 = vst [vmem:[#allocation5 + $0xb0] sm:$0xff] %v578_v1 }
 0x123   :  { %650 = vst [vmem:[#allocation5 + $0xb8] sm:$0xff] %v619_v2 }
 0x125   :  { %v498_v3 = vpop.f32.mrf.mxu0 }
 0x126   :  { %v539_v4 = vpop.f32.mrf.mxu1  ;;  %v499_v5 = vadd.f32 %v498_v3, %v2108_v18 }
 0x127   :  { %v540_v6 = vadd.f32 %v539_v4, %v2110_v19  ;;  %v580_v7 = vpop.f32.mrf.mxu2  ;;  %v621_v8 = vpop.f32.mrf.mxu3 }
 0x128   :  { %v581_v60 = vadd.f32 %v580_v7, %v2112_v9  ;;  %v622_v13 = vadd.f32 %v621_v8, %v2114_v10  ;;  %651 = vst [vmem:[#allocation5 + $0xc0] sm:$0xff] %v499_v5 }
 0x129   :  { %652 = vst [vmem:[#allocation5 + $0xc8] sm:$0xff] %v540_v6 }
 0x12a   :  { %653 = vst [vmem:[#allocation5 + $0xd0] sm:$0xff] %v581_v60 }
 0x12b   :  { %654 = vst [vmem:[#allocation5 + $0xd8] sm:$0xff] %v622_v13 }
 0x12d   :  { %v501_v14 = vpop.f32.mrf.mxu0 }
 0x12e   :  { %v542_v15 = vpop.f32.mrf.mxu1  ;;  %v502_v16 = vadd.f32 %v501_v14, %v2108_v18 }
 0x12f   :  { %v543_v17 = vadd.f32 %v542_v15, %v2110_v19  ;;  %v583_v20 = vpop.f32.mrf.mxu2  ;;  %v624_v11 = vpop.f32.mrf.mxu3 }
 0x130   :  { %v584_v12 = vadd.f32 %v583_v20, %v2112_v9  ;;  %v625_v21 = vadd.f32 %v624_v11, %v2114_v10  ;;  %655 = vst [vmem:[#allocation5 + $0xe0] sm:$0xff] %v502_v16 }
 0x131   :  { %656 = vst [vmem:[#allocation5 + $0xe8] sm:$0xff] %v543_v17 }
 0x132   :  { %657 = vst [vmem:[#allocation5 + $0xf0] sm:$0xff] %v584_v12 }
 0x133   :  { %658 = vst [vmem:[#allocation5 + $0xf8] sm:$0xff] %v625_v21 }
 0x134 LB: > { %v737_v18 = vld [vmem:[#allocation9 + $0x1e0] sm:$0xff]  ;;  %v738_v19 = vld [vmem:[#allocation9 + $0x1e8] sm:$0xff]  ;;  %v739_v9 = vld [vmem:[#allocation9 + $0x1f0] sm:$0xff]  ;;  %s1557_s1 = sshll.u32 %s1867_s6, 3  ;;  %s664_s6 = sadd.s32 1, %s1867_s6   ;;  %s1867_s6 = sphi %s2152_s6, %s664_s6   ;;  %v1863_v23 = vphi %v2150_v23, %v842_v23   ;;  %v1859_v22 = vphi %v2148_v22, %v840_v22  }
 0x135   : > { %741 = vmatpush.msra.mxu0 %v737_v18  ;;  %761 = vmatpush.msra.mxu1 %v738_v19  ;;  %v733_v10 = vld [vmem:[#allocation9 + $0x1c0] sm:$0xff]  ;;  %v734_v24 = vld [vmem:[#allocation9 + $0x1c8] sm:$0xff]  ;;  %v735_v25 = vld [vmem:[#allocation9 + $0x1d0] sm:$0xff]  ;;  %s668_s15 = sshra.s32 %s1557_s1, 3  ;;  %s843_s17 = scalar_lea.vmem [#allocation3], %s1557_s1 }
 0x136   : > { %781 = vmatpush.msra.mxu2 %v739_v9  ;;  %v729_v26 = vld [vmem:[#allocation9 + $0x1a0] sm:$0xff]  ;;  %v730_v27 = vld [vmem:[#allocation9 + $0x1a8] sm:$0xff]  ;;  %v731_v28 = vld [vmem:[#allocation9 + $0x1b0] sm:$0xff]  ;;  %s1564_s4 = sshll.u32 %s668_s15, 5  ;;  %p661_p0 = scmp.ge.s32.totalorder %s664_s6, 8  }
 0x137   : > { %742 = vmatpush.msra.mxu0 %v733_v10  ;;  %762 = vmatpush.msra.mxu1 %v734_v24  ;;  %v740_v29 = vld [vmem:[#allocation9 + $0x1f8] sm:$0xff]  ;;  %v725_v30 = vld [vmem:[#allocation9 + $0x180] sm:$0xff]  ;;  %v726_v31 = vld [vmem:[#allocation9 + $0x188] sm:$0xff]  ;;  %s672_s5 = scalar_lea.vmem [#allocation4], %s1564_s4  ;;  %s2184_s18 = smov (%p661_p0), 0  }
 0x138   : > { %782 = vmatpush.msra.mxu2 %v735_v25  ;;  %801 = vmatpush.msra.mxu3 %v740_v29  ;;  %v736_v32 = vld [vmem:[#allocation9 + $0x1d8] sm:$0xff]  ;;  %v727_v33 = vld [vmem:[#allocation9 + $0x190] sm:$0xff]  ;;  %v721_v35 = vld [vmem:[#allocation9 + $0x160] sm:$0xff] }
 0x139   : > { %743 = vmatpush.msra.mxu0 %v729_v26  ;;  %763 = vmatpush.msra.mxu1 %v730_v27  ;;  %v732_v34 = vld [vmem:[#allocation9 + $0x1b8] sm:$0xff]  ;;  %v722_v36 = vld [vmem:[#allocation9 + $0x168] sm:$0xff]  ;;  %v723_v37 = vld [vmem:[#allocation9 + $0x170] sm:$0xff] }
 0x13a   : > { %783 = vmatpush.msra.mxu2 %v731_v28  ;;  %802 = vmatpush.msra.mxu3 %v736_v32  ;;  %v728_v38 = vld [vmem:[#allocation9 + $0x198] sm:$0xff]  ;;  %v717_v39 = vld [vmem:[#allocation9 + $0x140] sm:$0xff]  ;;  %v718_v40 = vld [vmem:[#allocation9 + $0x148] sm:$0xff] }
 0x13b   : > { %744 = vmatpush.msra.mxu0 %v725_v30  ;;  %764 = vmatpush.msra.mxu1 %v726_v31  ;;  %v719_v41 = vld [vmem:[#allocation9 + $0x150] sm:$0xff]  ;;  %v724_v42 = vld [vmem:[#allocation9 + $0x178] sm:$0xff]  ;;  %v713_v43 = vld [vmem:[#allocation9 + $0x120] sm:$0xff] }
 0x13c   : > { %784 = vmatpush.msra.mxu2 %v727_v33  ;;  %803 = vmatpush.msra.mxu3 %v732_v34  ;;  %v714_v44 = vld [vmem:[#allocation9 + $0x128] sm:$0xff]  ;;  %v715_v45 = vld [vmem:[#allocation9 + $0x130] sm:$0xff]  ;;  %v720_v46 = vld [vmem:[#allocation9 + $0x158] sm:$0xff] }
 0x13d   : > { %745 = vmatpush.msra.mxu0 %v721_v35  ;;  %765 = vmatpush.msra.mxu1 %v722_v36  ;;  %v709_v47 = vld [vmem:[#allocation9 + $0x100] sm:$0xff]  ;;  %v710_v48 = vld [vmem:[#allocation9 + $0x108] sm:$0xff]  ;;  %v711_v49 = vld [vmem:[#allocation9 + $0x110] sm:$0xff] }
 0x13e   : > { %785 = vmatpush.msra.mxu2 %v723_v37  ;;  %804 = vmatpush.msra.mxu3 %v728_v38  ;;  %v716_v50 = vld [vmem:[#allocation9 + $0x138] sm:$0xff]  ;;  %v705_v51 = vld [vmem:[#allocation9 + $0xe0] sm:$0xff]  ;;  %v706_v52 = vld [vmem:[#allocation9 + $0xe8] sm:$0xff] }
 0x13f   : > { %746 = vmatpush.msra.mxu0 %v717_v39  ;;  %766 = vmatpush.msra.mxu1 %v718_v40  ;;  %v707_v53 = vld [vmem:[#allocation9 + $0xf0] sm:$0xff]  ;;  %v712_v54 = vld [vmem:[#allocation9 + $0x118] sm:$0xff]  ;;  %v701_v55 = vld [vmem:[#allocation9 + $0xc0] sm:$0xff] }
 0x140   : > { %786 = vmatpush.msra.mxu2 %v719_v41  ;;  %805 = vmatpush.msra.mxu3 %v724_v42  ;;  %v702_v56 = vld [vmem:[#allocation9 + $0xc8] sm:$0xff]  ;;  %v703_v57 = vld [vmem:[#allocation9 + $0xd0] sm:$0xff]  ;;  %v708_v58 = vld [vmem:[#allocation9 + $0xf8] sm:$0xff] }
 0x141   : > { %747 = vmatpush.msra.mxu0 %v713_v43  ;;  %767 = vmatpush.msra.mxu1 %v714_v44  ;;  %v697_v59 = vld [vmem:[#allocation9 + $0xa0] sm:$0xff]  ;;  %v698_v61 = vld [vmem:[#allocation9 + $0xa8] sm:$0xff]  ;;  %v699_v62 = vld [vmem:[#allocation9 + $0xb0] sm:$0xff] }
 0x142   : > { %787 = vmatpush.msra.mxu2 %v715_v45  ;;  %806 = vmatpush.msra.mxu3 %v720_v46  ;;  %v704_v63 = vld [vmem:[#allocation9 + $0xd8] sm:$0xff]  ;;  %v693_v0 = vld [vmem:[#allocation9 + $0x80] sm:$0xff]  ;;  %v694_v1 = vld [vmem:[#allocation9 + $0x88] sm:$0xff] }
 0x143   : > { %748 = vmatpush.msra.mxu0 %v709_v47  ;;  %768 = vmatpush.msra.mxu1 %v710_v48  ;;  %v695_v2 = vld [vmem:[#allocation9 + $0x90] sm:$0xff]  ;;  %v700_v3 = vld [vmem:[#allocation9 + $0xb8] sm:$0xff]  ;;  %v689_v4 = vld [vmem:[#allocation9 + $0x60] sm:$0xff] }
 0x144   : > { %788 = vmatpush.msra.mxu2 %v711_v49  ;;  %807 = vmatpush.msra.mxu3 %v716_v50  ;;  %v690_v5 = vld [vmem:[#allocation9 + $0x68] sm:$0xff]  ;;  %v691_v6 = vld [vmem:[#allocation9 + $0x70] sm:$0xff]  ;;  %v696_v7 = vld [vmem:[#allocation9 + $0x98] sm:$0xff]  ;;  %v2180_v49 = vmov (%p661_p0), 0.0   ;;  %v2182_v50 = vmov (%p661_p0), 0.0  }
 0x145   : > { %749 = vmatpush.msra.mxu0 %v705_v51  ;;  %769 = vmatpush.msra.mxu1 %v706_v52  ;;  %v685_v8 = vld [vmem:[#allocation9 + $0x40] sm:$0xff]  ;;  %v686_v60 = vld [vmem:[#allocation9 + $0x48] sm:$0xff]  ;;  %v687_v13 = vld [vmem:[#allocation9 + $0x50] sm:$0xff] }
 0x146   : > { %789 = vmatpush.msra.mxu2 %v707_v53  ;;  %808 = vmatpush.msra.mxu3 %v712_v54  ;;  %v692_v14 = vld [vmem:[#allocation9 + $0x78] sm:$0xff]  ;;  %v681_v15 = vld [vmem:[#allocation9 + $0x20] sm:$0xff]  ;;  %v682_v16 = vld [vmem:[#allocation9 + $0x28] sm:$0xff] }
 0x147   : > { %750 = vmatpush.msra.mxu0 %v701_v55  ;;  %770 = vmatpush.msra.mxu1 %v702_v56  ;;  %v683_v17 = vld [vmem:[#allocation9 + $0x30] sm:$0xff]  ;;  %v688_v20 = vld [vmem:[#allocation9 + $0x58] sm:$0xff]  ;;  %v677_v11 = vld [vmem:[#allocation9] sm:$0xff] }
 0x148   : > { %790 = vmatpush.msra.mxu2 %v703_v57  ;;  %809 = vmatpush.msra.mxu3 %v708_v58  ;;  %v678_v12 = vld [vmem:[#allocation9 + $0x8] sm:$0xff]  ;;  %v679_v21 = vld [vmem:[#allocation9 + $0x10] sm:$0xff]  ;;  %v684_v18 = vld [vmem:[#allocation9 + $0x38] sm:$0xff] }
 0x149   : > { %751 = vmatpush.msra.mxu0 %v697_v59  ;;  %771 = vmatpush.msra.mxu1 %v698_v61  ;;  %v680_v19 = vld [vmem:[#allocation9 + $0x18] sm:$0xff]  ;;  %v673_v9 = vld [vmem:[%s672_s5] sm:$0xff]  ;;  %v674_v10 = vld [vmem:[%s672_s5 + $0x8] sm:$0xff] }
 0x14a   : > { %791 = vmatpush.msra.mxu2 %v699_v62  ;;  %810 = vmatpush.msra.mxu3 %v704_v63  ;;  %v675_v30 = vld [vmem:[%s672_s5 + $0x10] sm:$0xff]  ;;  %v676_v33 = vld [vmem:[%s672_s5 + $0x18] sm:$0xff] }
 0x14b   : > { %752 = vmatpush.msra.mxu0 %v693_v0  ;;  %772 = vmatpush.msra.mxu1 %v694_v1 }
 0x14c   : > { %792 = vmatpush.msra.mxu2 %v695_v2  ;;  %811 = vmatpush.msra.mxu3 %v700_v3 }
 0x14d   : > { %753 = vmatpush.msra.mxu0 %v689_v4  ;;  %773 = vmatpush.msra.mxu1 %v690_v5 }
 0x14e   : > { %793 = vmatpush.msra.mxu2 %v691_v6  ;;  %812 = vmatpush.msra.mxu3 %v696_v7 }
 0x14f   : > { %754 = vmatpush.msra.mxu0 %v685_v8  ;;  %774 = vmatpush.msra.mxu1 %v686_v60 }
 0x150   : > { %794 = vmatpush.msra.mxu2 %v687_v13  ;;  %813 = vmatpush.msra.mxu3 %v692_v14 }
 0x151   : > { %755 = vmatpush.msra.mxu0 %v681_v15  ;;  %775 = vmatpush.msra.mxu1 %v682_v16 }
 0x152   : > { %795 = vmatpush.msra.mxu2 %v683_v17  ;;  %814 = vmatpush.msra.mxu3 %v688_v20 }
 0x153   : > { %756 = vmatpush.msra.mxu0 %v677_v11  ;;  %776 = vmatpush.msra.mxu1 %v678_v12 }
 0x154   : > { %796 = vmatpush.msra.mxu2 %v679_v21  ;;  %757 = vmatmul.f32.vlgmr.msra.gmra.mxu0 %v1863_v23 }
 0x155   : > { %777 = vmatmul.f32.vlgmr.msra.gmra.mxu1 %v1863_v23  ;;  %797 = vmatmul.f32.vlgmr.msra.gmra.mxu2 %v1863_v23 }
 0x156   : > { %815 = vmatpush.msra.mxu3 %v684_v18 }
 0x158   : > { %816 = vmatpush.msra.mxu3 %v680_v19 }
 0x159   : > { %817 = vmatmul.f32.vlgmr.msra.gmra.mxu3 %v1863_v23 }
 0x1d1   : > { %v758_v24 = vpop.f32.mrf.mxu0 }
 0x1d2   : > { %v821_v25 = vadd.f32 %v758_v24, %v673_v9  ;;  %v778_v26 = vpop.f32.mrf.mxu1 }
 0x1d3   : > { %v822_v27 = vadd.f32 %v778_v26, %v674_v10 }
 0x1d4   : > { %v825_v28 = vmul.f32 0.5, %v821_v25 }
 0x1d5   : > { %v829_v29 = vmul.f32 0.5, %v822_v27 }
 0x1d6   : > { %1642 = vtanh.f32 %v825_v28 }
 0x1d7   : > { %1644 = vtanh.f32 %v829_v29 }
 0x1d8   : > { %v798_v31 = vpop.f32.mrf.mxu2 }
 0x1d9   : > { %v823_v32 = vadd.f32 %v798_v31, %v675_v30 }
 0x1db   : > { %1646 = vtanh.f32 %v823_v32 }
 0x1dc   : > { %v1643_v23 = vpop.eup %1642  ;;  %v818_v34 = vpop.f32.mrf.mxu3 }
 0x1dd   : > { %v1645_v35 = vpop.eup %1644  ;;  %v827_v36 = vadd.f32 1.0, %v1643_v23  ;;  %v824_v37 = vadd.f32 %v818_v34, %v676_v33 }
 0x1de   : > { %v831_v38 = vadd.f32 1.0, %v1645_v35 }
 0x1df   : > { %v828_v39 = vmul.f32 0.5, %v827_v36  ;;  %v834_v40 = vmul.f32 0.5, %v824_v37 }
 0x1e0   : > { %v832_v41 = vmul.f32 0.5, %v831_v38 }
 0x1e1   : > { %v1647_v42 = vpop.eup %1646  ;;  %1648 = vtanh.f32 %v834_v40 }
 0x1e2   : > { %v838_v43 = vmul.f32 %v1859_v22, %v832_v41  ;;  %v839_v44 = vmul.f32 %v1647_v42, %v828_v39 }
 0x1e4   : > { %v840_v22 = vadd.f32 %v839_v44, %v838_v43  }
 0x1e6   : > { %1650 = vtanh.f32 %v840_v22 }
 0x1e7   : > { %v1649_v45 = vpop.eup %1648 }
 0x1e8   : > { %v836_v46 = vadd.f32 1.0, %v1649_v45 }
 0x1ea   : > { %v837_v47 = vmul.f32 0.5, %v836_v46 }
 0x1eb   :  { %663 = sbr.rel (!%p661_p0) target bundleno = 308 (0x134), region = 124 }
 0x1ec   : > { %v1651_v48 = vpop.eup %1650 }
 0x1ed   : > { %v842_v23 = vmul.f32 %v1651_v48, %v837_v47  }
 0x1ef   : > { %844 = vst [vmem:[%s843_s17] sm:$0xff] %v842_v23 }
 0x1f0 LB: > { %v924_v51 = vld [vmem:[#allocation12 + $0x1e0] sm:$0xff]  ;;  %v925_v52 = vld [vmem:[#allocation12 + $0x1e8] sm:$0xff]  ;;  %v926_v53 = vld [vmem:[#allocation12 + $0x1f0] sm:$0xff]  ;;  %s853_s3 = ssub.s32 7, %s1879_s18  ;;  %vm1110_vm0 = vcmask 64512   ;;  %s850_s18 = sadd.s32 1, %s1879_s18   ;;  %s1879_s18 = sphi %s2184_s18, %s850_s18   ;;  %v1875_v50 = vphi %v2182_v50, %v1029_v50   ;;  %v1871_v49 = vphi %v2180_v49, %v1027_v49  }
 0x1f1   : > { %928 = vmatpush.msra.mxu0 %v924_v51  ;;  %948 = vmatpush.msra.mxu1 %v925_v52  ;;  %v920_v22 = vld [vmem:[#allocation12 + $0x1c0] sm:$0xff]  ;;  %v921_v54 = vld [vmem:[#allocation12 + $0x1c8] sm:$0xff]  ;;  %v922_v55 = vld [vmem:[#allocation12 + $0x1d0] sm:$0xff]  ;;  %s2260_s4 = sshll.u32 %s853_s3, 3  ;;  %p847_p1 = scmp.ge.s32.totalorder %s850_s18, 8  }
 0x1f2   : > { %968 = vmatpush.msra.mxu2 %v926_v53  ;;  %v916_v56 = vld [vmem:[#allocation12 + $0x1a0] sm:$0xff]  ;;  %v917_v57 = vld [vmem:[#allocation12 + $0x1a8] sm:$0xff]  ;;  %v918_v58 = vld [vmem:[#allocation12 + $0x1b0] sm:$0xff]  ;;  %s855_s25 = sshra.s32 %s2260_s4, 3  ;;  %s1030_s22 = scalar_lea.vmem [#allocation3], %s2260_s4 }
 0x1f3   : > { %929 = vmatpush.msra.mxu0 %v920_v22  ;;  %949 = vmatpush.msra.mxu1 %v921_v54  ;;  %v927_v59 = vld [vmem:[#allocation12 + $0x1f8] sm:$0xff]  ;;  %v912_v61 = vld [vmem:[#allocation12 + $0x180] sm:$0xff]  ;;  %v913_v62 = vld [vmem:[#allocation12 + $0x188] sm:$0xff]  ;;  %s1565_s29 = sshll.u32 %s855_s25, 5  ;;  %s1109_s26 = scalar_lea.vmem [#allocation2], %s2260_s4 }
 0x1f4   : > { %969 = vmatpush.msra.mxu2 %v922_v55  ;;  %988 = vmatpush.msra.mxu3 %v927_v59  ;;  %v923_v63 = vld [vmem:[#allocation12 + $0x1d8] sm:$0xff]  ;;  %v914_v0 = vld [vmem:[#allocation12 + $0x190] sm:$0xff]  ;;  %v908_v2 = vld [vmem:[#allocation12 + $0x160] sm:$0xff]  ;;  %s859_s23 = scalar_lea.vmem [#allocation5], %s1565_s29  ;;  %s2324_s29 = smov (%p847_p1), 1  }
 0x1f5   : > { %930 = vmatpush.msra.mxu0 %v916_v56  ;;  %950 = vmatpush.msra.mxu1 %v917_v57  ;;  %v919_v1 = vld [vmem:[#allocation12 + $0x1b8] sm:$0xff]  ;;  %v909_v3 = vld [vmem:[#allocation12 + $0x168] sm:$0xff]  ;;  %v910_v4 = vld [vmem:[#allocation12 + $0x170] sm:$0xff] }
 0x1f6   : > { %970 = vmatpush.msra.mxu2 %v918_v58  ;;  %989 = vmatpush.msra.mxu3 %v923_v63  ;;  %v915_v5 = vld [vmem:[#allocation12 + $0x198] sm:$0xff]  ;;  %v904_v6 = vld [vmem:[#allocation12 + $0x140] sm:$0xff]  ;;  %v905_v7 = vld [vmem:[#allocation12 + $0x148] sm:$0xff] }
 0x1f7   : > { %931 = vmatpush.msra.mxu0 %v912_v61  ;;  %951 = vmatpush.msra.mxu1 %v913_v62  ;;  %v906_v8 = vld [vmem:[#allocation12 + $0x150] sm:$0xff]  ;;  %v911_v60 = vld [vmem:[#allocation12 + $0x178] sm:$0xff]  ;;  %v900_v13 = vld [vmem:[#allocation12 + $0x120] sm:$0xff] }
 0x1f8   : > { %971 = vmatpush.msra.mxu2 %v914_v0  ;;  %990 = vmatpush.msra.mxu3 %v919_v1  ;;  %v901_v14 = vld [vmem:[#allocation12 + $0x128] sm:$0xff]  ;;  %v902_v15 = vld [vmem:[#allocation12 + $0x130] sm:$0xff]  ;;  %v907_v16 = vld [vmem:[#allocation12 + $0x158] sm:$0xff] }
 0x1f9   : > { %932 = vmatpush.msra.mxu0 %v908_v2  ;;  %952 = vmatpush.msra.mxu1 %v909_v3  ;;  %v896_v17 = vld [vmem:[#allocation12 + $0x100] sm:$0xff]  ;;  %v897_v20 = vld [vmem:[#allocation12 + $0x108] sm:$0xff]  ;;  %v898_v11 = vld [vmem:[#allocation12 + $0x110] sm:$0xff] }
 0x1fa   : > { %972 = vmatpush.msra.mxu2 %v910_v4  ;;  %991 = vmatpush.msra.mxu3 %v915_v5  ;;  %v903_v12 = vld [vmem:[#allocation12 + $0x138] sm:$0xff]  ;;  %v892_v21 = vld [vmem:[#allocation12 + $0xe0] sm:$0xff]  ;;  %v893_v18 = vld [vmem:[#allocation12 + $0xe8] sm:$0xff] }
 0x1fb   : > { %933 = vmatpush.msra.mxu0 %v904_v6  ;;  %953 = vmatpush.msra.mxu1 %v905_v7  ;;  %v894_v19 = vld [vmem:[#allocation12 + $0xf0] sm:$0xff]  ;;  %v899_v9 = vld [vmem:[#allocation12 + $0x118] sm:$0xff]  ;;  %v888_v10 = vld [vmem:[#allocation12 + $0xc0] sm:$0xff] }
 0x1fc   : > { %973 = vmatpush.msra.mxu2 %v906_v8  ;;  %992 = vmatpush.msra.mxu3 %v911_v60  ;;  %v889_v24 = vld [vmem:[#allocation12 + $0xc8] sm:$0xff]  ;;  %v890_v25 = vld [vmem:[#allocation12 + $0xd0] sm:$0xff]  ;;  %v895_v26 = vld [vmem:[#allocation12 + $0xf8] sm:$0xff] }
 0x1fd   : > { %934 = vmatpush.msra.mxu0 %v900_v13  ;;  %954 = vmatpush.msra.mxu1 %v901_v14  ;;  %v884_v27 = vld [vmem:[#allocation12 + $0xa0] sm:$0xff]  ;;  %v885_v28 = vld [vmem:[#allocation12 + $0xa8] sm:$0xff]  ;;  %v886_v29 = vld [vmem:[#allocation12 + $0xb0] sm:$0xff] }
 0x1fe   : > { %974 = vmatpush.msra.mxu2 %v902_v15  ;;  %993 = vmatpush.msra.mxu3 %v907_v16  ;;  %v891_v30 = vld [vmem:[#allocation12 + $0xd8] sm:$0xff]  ;;  %v880_v31 = vld [vmem:[#allocation12 + $0x80] sm:$0xff]  ;;  %v881_v32 = vld [vmem:[#allocation12 + $0x88] sm:$0xff] }
 0x1ff   : > { %935 = vmatpush.msra.mxu0 %v896_v17  ;;  %955 = vmatpush.msra.mxu1 %v897_v20  ;;  %v882_v33 = vld [vmem:[#allocation12 + $0x90] sm:$0xff]  ;;  %v887_v23 = vld [vmem:[#allocation12 + $0xb8] sm:$0xff]  ;;  %v876_v34 = vld [vmem:[#allocation12 + $0x60] sm:$0xff] }
 0x200   : > { %975 = vmatpush.msra.mxu2 %v898_v11  ;;  %994 = vmatpush.msra.mxu3 %v903_v12  ;;  %v877_v35 = vld [vmem:[#allocation12 + $0x68] sm:$0xff]  ;;  %v878_v36 = vld [vmem:[#allocation12 + $0x70] sm:$0xff]  ;;  %v883_v37 = vld [vmem:[#allocation12 + $0x98] sm:$0xff] }
 0x201   : > { %936 = vmatpush.msra.mxu0 %v892_v21  ;;  %956 = vmatpush.msra.mxu1 %v893_v18  ;;  %v872_v38 = vld [vmem:[#allocation12 + $0x40] sm:$0xff]  ;;  %v873_v39 = vld [vmem:[#allocation12 + $0x48] sm:$0xff]  ;;  %v874_v40 = vld [vmem:[#allocation12 + $0x50] sm:$0xff] }
 0x202   : > { %976 = vmatpush.msra.mxu2 %v894_v19  ;;  %995 = vmatpush.msra.mxu3 %v899_v9  ;;  %v879_v41 = vld [vmem:[#allocation12 + $0x78] sm:$0xff]  ;;  %v868_v42 = vld [vmem:[#allocation12 + $0x20] sm:$0xff]  ;;  %v869_v43 = vld [vmem:[#allocation12 + $0x28] sm:$0xff] }
 0x203   : > { %937 = vmatpush.msra.mxu0 %v888_v10  ;;  %957 = vmatpush.msra.mxu1 %v889_v24  ;;  %v870_v44 = vld [vmem:[#allocation12 + $0x30] sm:$0xff]  ;;  %v875_v45 = vld [vmem:[#allocation12 + $0x58] sm:$0xff]  ;;  %v864_v46 = vld [vmem:[#allocation12] sm:$0xff] }
 0x204   : > { %977 = vmatpush.msra.mxu2 %v890_v25  ;;  %996 = vmatpush.msra.mxu3 %v895_v26  ;;  %v865_v47 = vld [vmem:[#allocation12 + $0x8] sm:$0xff]  ;;  %v866_v48 = vld [vmem:[#allocation12 + $0x10] sm:$0xff]  ;;  %v871_v51 = vld [vmem:[#allocation12 + $0x38] sm:$0xff] }
 0x205   : > { %938 = vmatpush.msra.mxu0 %v884_v27  ;;  %958 = vmatpush.msra.mxu1 %v885_v28  ;;  %v1063_v52 = vld [vmem:[%s2542_s8 + $0x78] sm:$0xff]  ;;  %v1062_v54 = vld [vmem:[%s2542_s8 + $0x70] sm:$0xff]  ;;  %v1061_v56 = vld [vmem:[%s2542_s8 + $0x68] sm:$0xff] }
 0x206   : > { %978 = vmatpush.msra.mxu2 %v886_v29  ;;  %997 = vmatpush.msra.mxu3 %v891_v30  ;;  %v1047_v53 = vld [vmem:[%s2541_s7 + $0x78] sm:$0xff]  ;;  %v1046_v55 = vld [vmem:[%s2541_s7 + $0x70] sm:$0xff]  ;;  %v1045_v57 = vld [vmem:[%s2541_s7 + $0x68] sm:$0xff] }
 0x207   : > { %939 = vmatpush.msra.mxu0 %v880_v31  ;;  %959 = vmatpush.msra.mxu1 %v881_v32  ;;  %v867_v22 = vld [vmem:[#allocation12 + $0x18] sm:$0xff]  ;;  %v1044_v58 = vld [vmem:[%s2541_s7 + $0x60] sm:$0xff]  ;;  %v1058_v62 = vld [vmem:[%s2542_s8 + $0x50] sm:$0xff] }
 0x208   : > { %979 = vmatpush.msra.mxu2 %v882_v33  ;;  %998 = vmatpush.msra.mxu3 %v887_v23  ;;  %v1059_v59 = vld [vmem:[%s2542_s8 + $0x58] sm:$0xff]  ;;  %v1042_v63 = vld [vmem:[%s2541_s7 + $0x50] sm:$0xff]  ;;  %v1057_v0 = vld [vmem:[%s2542_s8 + $0x48] sm:$0xff] }
 0x209   : > { %940 = vmatpush.msra.mxu0 %v876_v34  ;;  %960 = vmatpush.msra.mxu1 %v877_v35  ;;  %v1043_v61 = vld [vmem:[%s2541_s7 + $0x58] sm:$0xff]  ;;  %v1041_v1 = vld [vmem:[%s2541_s7 + $0x48] sm:$0xff]  ;;  %v1056_v2 = vld [vmem:[%s2542_s8 + $0x40] sm:$0xff] }
 0x20a   : > { %980 = vmatpush.msra.mxu2 %v878_v36  ;;  %999 = vmatpush.msra.mxu3 %v883_v37  ;;  %v1040_v3 = vld [vmem:[%s2541_s7 + $0x40] sm:$0xff]  ;;  %v1055_v4 = vld [vmem:[%s2542_s8 + $0x38] sm:$0xff]  ;;  %v1054_v6 = vld [vmem:[%s2542_s8 + $0x30] sm:$0xff] }
 0x20b   : > { %941 = vmatpush.msra.mxu0 %v872_v38  ;;  %961 = vmatpush.msra.mxu1 %v873_v39  ;;  %v1039_v5 = vld [vmem:[%s2541_s7 + $0x38] sm:$0xff]  ;;  %v1038_v7 = vld [vmem:[%s2541_s7 + $0x30] sm:$0xff]  ;;  %v1053_v8 = vld [vmem:[%s2542_s8 + $0x28] sm:$0xff] }
 0x20c   : > { %981 = vmatpush.msra.mxu2 %v874_v40  ;;  %1000 = vmatpush.msra.mxu3 %v879_v41  ;;  %v1037_v60 = vld [vmem:[%s2541_s7 + $0x28] sm:$0xff]  ;;  %v1052_v13 = vld [vmem:[%s2542_s8 + $0x20] sm:$0xff]  ;;  %v1051_v15 = vld [vmem:[%s2542_s8 + $0x18] sm:$0xff] }
 0x20d   : > { %942 = vmatpush.msra.mxu0 %v868_v42  ;;  %962 = vmatpush.msra.mxu1 %v869_v43  ;;  %v1036_v14 = vld [vmem:[%s2541_s7 + $0x20] sm:$0xff]  ;;  %v1035_v16 = vld [vmem:[%s2541_s7 + $0x18] sm:$0xff]  ;;  %v1050_v17 = vld [vmem:[%s2542_s8 + $0x10] sm:$0xff] }
 0x20e   : > { %982 = vmatpush.msra.mxu2 %v870_v44  ;;  %1001 = vmatpush.msra.mxu3 %v875_v45  ;;  %v1034_v20 = vld [vmem:[%s2541_s7 + $0x10] sm:$0xff]  ;;  %v1049_v11 = vld [vmem:[%s2542_s8 + $0x8] sm:$0xff]  ;;  %v1048_v21 = vld [vmem:[%s2542_s8] sm:$0xff] }
 0x20f   : > { %943 = vmatpush.msra.mxu0 %v864_v46  ;;  %963 = vmatpush.msra.mxu1 %v865_v47  ;;  %v1033_v12 = vld [vmem:[%s2541_s7 + $0x8] sm:$0xff]  ;;  %v1032_v18 = vld [vmem:[%s2541_s7] sm:$0xff]  ;;  %v862_v30 = vld [vmem:[%s859_s23 + $0x10] sm:$0xff] }
 0x210   : > { %983 = vmatpush.msra.mxu2 %v866_v48  ;;  %944 = vmatmul.f32.vlgmr.msra.gmra.mxu0 %v1875_v50  ;;  %v1031_v19 = vld [vmem:[%s1030_s22] sm:$0xff]  ;;  %v861_v10 = vld [vmem:[%s859_s23 + $0x8] sm:$0xff]  ;;  %v863_v33 = vld [vmem:[%s859_s23 + $0x18] sm:$0xff] }
 0x211   : > { %964 = vmatmul.f32.vlgmr.msra.gmra.mxu1 %v1875_v50  ;;  %984 = vmatmul.f32.vlgmr.msra.gmra.mxu2 %v1875_v50  ;;  %v860_v9 = vld [vmem:[%s859_s23] sm:$0xff] }
 0x212   : > { %1002 = vmatpush.msra.mxu3 %v871_v51  ;;  %1064 = vmatpush.msrb.mxu0 %v1063_v52  ;;  %v1652_v52 = vld [vmem:[%s2543_s9] ss:$0 sm:$0xff] }
 0x213   : > { %1084 = vmatpush.msrb.mxu1 %v1047_v53 }
 0x214   : > { %1003 = vmatpush.msra.mxu3 %v867_v22  ;;  %1065 = vmatpush.msrb.mxu0 %v1062_v54 }
 0x215   : > { %1004 = vmatmul.f32.vlgmr.msra.gmra.mxu3 %v1875_v50  ;;  %1085 = vmatpush.msrb.mxu1 %v1046_v55  ;;  %v1060_v50 = vld [vmem:[%s2542_s8 + $0x60] sm:$0xff] }
 0x216   : > { %1066 = vmatpush.msrb.mxu0 %v1061_v56  ;;  %v2316_v55 = vld [vmem:[%s2546_s12] sm:$0xff] (%p847_p1) }
 0x217   : > { %1086 = vmatpush.msrb.mxu1 %v1045_v57  ;;  %v1895_v57 = vmov (%p847_p1), 0  }
 0x218   : > { %1067 = vmatpush.msrb.mxu0 %v1060_v50  ;;  %1114 = vst.msk [vmem:[#allocation15] sm:$0xff] (%p847_p1), %vm1110_vm0, %v1895_v57 }
 0x219   : > { %1087 = vmatpush.msrb.mxu1 %v1044_v58  ;;  %v1663_v58 = vld [vmem:[%s2544_s10] ss:$0 sm:$0xff] (%p847_p1) }
 0x21a   : > { %1068 = vmatpush.msrb.mxu0 %v1059_v59 }
 0x21b   : > { %1088 = vmatpush.msrb.mxu1 %v1043_v61 }
 0x21c   : > { %1069 = vmatpush.msrb.mxu0 %v1058_v62 }
 0x21d   : > { %1089 = vmatpush.msrb.mxu1 %v1042_v63 }
 0x21e   : > { %1070 = vmatpush.msrb.mxu0 %v1057_v0 }
 0x21f   : > { %1090 = vmatpush.msrb.mxu1 %v1041_v1 }
 0x220   : > { %1071 = vmatpush.msrb.mxu0 %v1056_v2 }
 0x221   : > { %1091 = vmatpush.msrb.mxu1 %v1040_v3 }
 0x222   : > { %1072 = vmatpush.msrb.mxu0 %v1055_v4 }
 0x223   : > { %1092 = vmatpush.msrb.mxu1 %v1039_v5 }
 0x224   : > { %1073 = vmatpush.msrb.mxu0 %v1054_v6 }
 0x225   : > { %1093 = vmatpush.msrb.mxu1 %v1038_v7 }
 0x226   : > { %1074 = vmatpush.msrb.mxu0 %v1053_v8 }
 0x227   : > { %1094 = vmatpush.msrb.mxu1 %v1037_v60 }
 0x228   : > { %1075 = vmatpush.msrb.mxu0 %v1052_v13 }
 0x229   : > { %1095 = vmatpush.msrb.mxu1 %v1036_v14 }
 0x22a   : > { %1076 = vmatpush.msrb.mxu0 %v1051_v15 }
 0x22b   : > { %1096 = vmatpush.msrb.mxu1 %v1035_v16 }
 0x22c   : > { %1077 = vmatpush.msrb.mxu0 %v1050_v17 }
 0x22d   : > { %1097 = vmatpush.msrb.mxu1 %v1034_v20 }
 0x22e   : > { %1078 = vmatpush.msrb.mxu0 %v1049_v11 }
 0x22f   : > { %1098 = vmatpush.msrb.mxu1 %v1033_v12 }
 0x230   : > { %1079 = vmatpush.msrb.mxu0 %v1048_v21 }
 0x231   : > { %1099 = vmatpush.msrb.mxu1 %v1032_v18 }
 0x232   : > { %1100 = vmatmul.f32.vlgmr.msrb.gmra.mxu1 %v1031_v19 }
 0x28d   : > { %v945_v24 = vpop.f32.mrf.mxu0 }
 0x28e   : > { %v1008_v25 = vadd.f32 %v945_v24, %v860_v9  ;;  %v965_v26 = vpop.f32.mrf.mxu1 }
 0x28f   : > { %v1009_v27 = vadd.f32 %v965_v26, %v861_v10 }
 0x290   : > { %v1012_v28 = vmul.f32 0.5, %v1008_v25 }
 0x291   : > { %v1016_v29 = vmul.f32 0.5, %v1009_v27 }
 0x292   : > { %1653 = vtanh.f32 %v1012_v28 }
 0x293   : > { %1655 = vtanh.f32 %v1016_v29 }
 0x294   : > { %v985_v31 = vpop.f32.mrf.mxu2 }
 0x295   : > { %v1010_v32 = vadd.f32 %v985_v31, %v862_v30 }
 0x297   : > { %1657 = vtanh.f32 %v1010_v32 }
 0x298   : > { %v1654_v23 = vpop.eup %1653  ;;  %v1005_v34 = vpop.f32.mrf.mxu3 }
 0x299   : > { %v1656_v35 = vpop.eup %1655  ;;  %v1014_v36 = vadd.f32 1.0, %v1654_v23  ;;  %v1011_v37 = vadd.f32 %v1005_v34, %v863_v33 }
 0x29a   : > { %v1018_v38 = vadd.f32 1.0, %v1656_v35 }
 0x29b   : > { %v1015_v39 = vmul.f32 0.5, %v1014_v36  ;;  %v1021_v40 = vmul.f32 0.5, %v1011_v37 }
 0x29c   : > { %v1019_v41 = vmul.f32 0.5, %v1018_v38 }
 0x29d   : > { %v1658_v42 = vpop.eup %1657  ;;  %1659 = vtanh.f32 %v1021_v40 }
 0x29e   : > { %v1025_v43 = vmul.f32 %v1871_v49, %v1019_v41  ;;  %v1026_v44 = vmul.f32 %v1658_v42, %v1015_v39 }
 0x2a0   : > { %v1027_v49 = vadd.f32 %v1026_v44, %v1025_v43  }
 0x2a2   : > { %1661 = vtanh.f32 %v1027_v49 }
 0x2a3   : > { %v1660_v45 = vpop.eup %1659 }
 0x2a4   : > { %v1023_v46 = vadd.f32 1.0, %v1660_v45 }
 0x2a6   : > { %v1024_v47 = vmul.f32 0.5, %v1023_v46 }
 0x2a8   : > { %v1662_v48 = vpop.eup %1661 }
 0x2a9   : > { %v1029_v50 = vmul.f32 %v1662_v48, %v1024_v47  }
 0x2ab   : > { %1080 = vmatmul.f32.vlgmr.msrb.gmra.mxu0 %v1029_v50 }
 0x2af   : > { %v1101_v51 = vpop.f32.mrf.mxu1 }
 0x328   : > { %v1081_v53 = vpop.f32.mrf.mxu0 }
 0x329   : > { %v1102_v22 = vadd.f32 %v1101_v51, %v1081_v53  ;;  %849 = sbr.rel (!%p847_p1) target bundleno = 496 (0x1f0), region = 135 }
 0x32b   : > { %v1108_v54 = vadd.f32 %v1652_v52, %v1102_v22 }
 0x32d   : > { %1111 = vst.msk [vmem:[%s1109_s26] sm:$0xff] %vm1110_vm0, %v1108_v54 }
 0x334   :  { %v1116_v56 = vld [vmem:[#allocation2] sm:$0xff] }
 0x335   :  { %v1120_v59 = vadd.f32 %v1663_v58, %v1116_v56  }
 0x336 LB: > { %v1136_v49 = vperm.slane %v1883_v59, 0  ;;  %v1132_v50 = vrot.slane %v1883_v59, 4  ;;  %v1130_v61 = vrot.slane %v1883_v59, 2  ;;  %v1129_v62 = vrot.slane %v1883_v59, 1  ;;  %s1563_s7 = sshll.u32 %s1887_s29, 3  ;;  %s1126_s29 = sadd.s32 1, %s1887_s29   ;;  %s1887_s29 = sphi %s2324_s29, %s1126_s29   ;;  %v1883_v59 = vphi %v1120_v59, %v2549_v59  }
 0x337   : > { %v1133_v63 = vrot.slane %v1883_v59, 5  ;;  %v1131_v0 = vrot.slane %v1883_v59, 3  ;;  %v1184_v1 = vlaneseq  ;;  %v1134_v14 = vrot.slane %v1883_v59, 6  ;;  %s1347_s8 = scalar_lea.vmem [#allocation2], %s1563_s7  ;;  %s1345_s9 = scalar_lea.vmem [#allocation15], %s1563_s7 }
 0x338   : > { %v2331_v2 = vadd.f32 %v1136_v49, %v2316_v55  ;;  %v1140_v3 = vperm.slane %v1132_v50, 0  ;;  %v1138_v4 = vperm.slane %v1130_v61, 0  ;;  %v1137_v5 = vperm.slane %v1129_v62, 0  ;;  %v1348_v29 = vld [vmem:[%s1347_s8] sm:$0xff]  ;;  %p1123_p2 = scmp.ge.s32.totalorder %s1126_s29, 8  }
 0x339   : > { %v1141_v6 = vperm.slane %v1133_v63, 0  ;;  %v1139_v13 = vperm.slane %v1131_v0, 0  ;;  %v1352_v20 = vshrl.u32 %v1184_v1, 7  ;;  %v1135_v21 = vrot.slane %v1883_v59, 7  ;;  %s1483_s30 = sshll.u32 (%p1123_p2), %s2547_s13, 4  ;;  %s1897_s3 = smov (%p1123_p2), [#allocation14]   ;;  %s1484_s30 = int_to_ptr.hbm [resolvable:$true] %s1483_s30 }
 0x33a   : > { %v1160_v7 = vsel %vm1110_vm0, %v2331_v2, -inf  ;;  %v2336_v8 = vadd.f32 %v1140_v3, %v2316_v55  ;;  %v2339_v60 = vadd.f32 %v1138_v4, %v2316_v55  ;;  %v2346_v17 = vadd.f32 %v1137_v5, %v2316_v55  ;;  %s1481_s16 = sshll.u32 (%p1123_p2), %s1897_s3, 4  ;;  %s1898_s6 = smov (%p1123_p2), [#allocation15]   ;;  %s1482_s16 = int_to_ptr.vmem [resolvable:$true] %s1481_s16 }
 0x33b   : > { %1161 = vmax.xlane.f32.xlu0 %v1160_v7  ;;  %v2350_v11 = vadd.f32 %v1141_v6, %v2316_v55  ;;  %v2353_v12 = vadd.f32 %v1139_v13, %v2316_v55  ;;  %1666 = vset.pattern.permute.xlu2 %v1352_v20  ;;  %v1142_v19 = vperm.slane %v1134_v14, 0  ;;  %v1143_v24 = vperm.slane %v1135_v21, 0  ;;  %s1491_s1 = sshll.u32 (%p1123_p2), %s1898_s6, 4  ;;  %s1493_s17 = sshll.u32 (%p1123_p2), %s2548_s14, 4  ;;  %s1492_s1 = int_to_ptr.vmem [resolvable:$true] %s1491_s1  ;;  %s1494_s17 = int_to_ptr.hbm [resolvable:$true] %s1493_s17 }
 0x33c   : > { %v1172_v15 = vsel %vm1110_vm0, %v2336_v8, -inf  ;;  %v1166_v16 = vsel %vm1110_vm0, %v2339_v60, -inf  ;;  %1664 = vset.pattern.permute.xlu0 %v1352_v20  ;;  %1665 = vset.pattern.permute.xlu1 %v1352_v20  ;;  %v1163_v18 = vsel %vm1110_vm0, %v2346_v17, -inf  ;;  %v1364_v30 = vperm.slane %v1348_v29, 2  ;;  %s1900_s19 = smov (%p1123_p2), 8  }
 0x33d   : > { %1173 = vmax.xlane.f32.xlu2 %v1172_v15  ;;  %1167 = vmax.xlane.f32.xlu1 %v1166_v16  ;;  %v1175_v9 = vsel %vm1110_vm0, %v2350_v11, -inf  ;;  %v1169_v10 = vsel %vm1110_vm0, %v2353_v12, -inf  ;;  %v2362_v25 = vadd.f32 %v1142_v19, %v2316_v55  ;;  %v2365_v26 = vadd.f32 %v1143_v24, %v2316_v55 }
 0x33e   : > { %v1350_v31 = vperm.slane %v1348_v29, 0  ;;  %v1371_v32 = vperm.slane %v1348_v29, 3  ;;  %v1357_v33 = vperm.slane %v1348_v29, 1  ;;  %v1399_v23 = vperm.slane %v1348_v29, 7 }
 0x33f   : > { %v1178_v27 = vsel %vm1110_vm0, %v2362_v25, -inf  ;;  %v1181_v28 = vsel %vm1110_vm0, %v2365_v26, -inf  ;;  %v1385_v34 = vperm.slane %v1348_v29, 5  ;;  %v1378_v35 = vperm.slane %v1348_v29, 4 }
 0x340   : > { %v1392_v36 = vperm.slane %v1348_v29, 6  ;;  %v1896_v37 = vmov 0   ;;  %v2382_v56 = vand.u32 127, %v1184_v1  ;;  %vm1330_vm9 = vcmask 1041409  }
 0x341   : > { %vm1332_vm10 = vcmask 1042434   ;;  %vm1334_vm11 = vcmask 1043459   ;;  %vm1336_vm12 = vcmask 1044484  }
 0x343   : > { %1164 = vmax.xlane.f32.xlu0 %v1163_v18 }
 0x345   : > { %1176 = vmax.xlane.f32.xlu2 %v1175_v9  ;;  %1170 = vmax.xlane.f32.xlu1 %v1169_v10 }
 0x34b   : > { %1179 = vmax.xlane.f32.xlu0 %v1178_v27 }
 0x34d   : > { %1182 = vmax.xlane.f32.xlu1 %v1181_v28 }
 0x35d   : > { %1369 = vperm.xlu2 %1666, %v1364_v30  }
 0x35f   : > { %1355 = vperm.xlu0 %1664, %v1350_v31  }
 0x365   : > { %1376 = vperm.xlu2 %1666, %v1371_v32  }
 0x366   : > { %1362 = vperm.xlu1 %1665, %v1357_v33  }
 0x367   : > { %1404 = vperm.xlu0 %1664, %v1399_v23  }
 0x36d   : > { %1390 = vperm.xlu2 %1666, %v1385_v34  }
 0x36e   : > { %1383 = vperm.xlu1 %1665, %v1378_v35  }
 0x36f   : > { %1669 = vset.pattern.permute.xlu0 %v1896_v37 }
 0x375   : > { %1667 = vset.pattern.permute.xlu2 %v1896_v37 }
 0x376   : > { %1397 = vperm.xlu1 %1665, %v1392_v36  }
 0x37e   : > { %1668 = vset.pattern.permute.xlu1 %v1896_v37 }
 0x3ae   : > { %v1162_v39 = vpop.xlane.xlu0 %1161 }
 0x3af   : > { %vm1186_vm3 = vcmp.eq.f32.partialorder %v2331_v2, %v1162_v39 }
 0x3b0   : > { %v1174_v38 = vpop.xlane.xlu2 %1173  ;;  %v1168_v41 = vpop.xlane.xlu1 %1167  ;;  %v1194_v3 = vsel %vm1186_vm3, %v2382_v56, 8 }
 0x3b1   : > { %vm1188_vm1 = vcmp.eq.f32.partialorder %v2339_v60, %v1168_v41  ;;  %v2405_v4 = vsel %vm1110_vm0, %v1194_v3, 2147483647  ;;  %vm1190_vm6 = vcmp.eq.f32.partialorder %v2336_v8, %v1174_v38 }
 0x3b2   : > { %v1196_v58 = vsel %vm1188_vm1, %v2382_v56, 8  ;;  %v1204_v5 = vshra.s32 %v2405_v4, 16  ;;  %v1198_v16 = vsel %vm1190_vm6, %v2382_v56, 8  ;;  %vm1338_vm6 = vcmask 1045509  }
 0x3b3   : > { %v2386_v49 = vsel %vm1110_vm0, %v1196_v58, 2147483647 }
 0x3b4   : > { %v1234_v50 = vshra.s32 %v2386_v49, 16  ;;  %v2412_v60 = vcvt.s32.f32 %v1204_v5 }
 0x3b6   : > { %v1165_v42 = vpop.xlane.xlu0 %1164  ;;  %v2392_v62 = vcvt.s32.f32 %v1234_v50 }
 0x3b7   : > { %vm1187_vm4 = vcmp.eq.f32.partialorder %v2346_v17, %v1165_v42 }
 0x3b8   : > { %v2374_v40 = vpop.xlane.xlu2 %1176  ;;  %v1171_v45 = vpop.xlane.xlu1 %1170  ;;  %v1195_v6 = vsel %vm1187_vm4, %v2382_v56, 8 }
 0x3b9   : > { %vm1191_vm2 = vcmp.eq.f32.partialorder %v2350_v11, %v2374_v40  ;;  %vm1189_vm5 = vcmp.eq.f32.partialorder %v2353_v12, %v1171_v45  ;;  %v2415_v13 = vsel %vm1110_vm0, %v1195_v6, 2147483647  ;;  %v2433_v12 = vsel %vm1110_vm0, %v1198_v16, 2147483647 }
 0x3ba   : > { %v1199_v61 = vsel %vm1191_vm2, %v2382_v56, 8  ;;  %v1197_v7 = vsel %vm1189_vm5, %v2382_v56, 8  ;;  %v1219_v14 = vshra.s32 %v2415_v13, 16  ;;  %v1264_v21 = vshra.s32 %v2433_v12, 16 }
 0x3bb   : > { %v2395_v63 = vsel %vm1110_vm0, %v1199_v61, 2147483647  ;;  %v2418_v2 = vsel %vm1110_vm0, %v1197_v7, 2147483647  ;;  %v1218_v50 = vand.u32 65535, %v2415_v13  ;;  %v1263_v6 = vand.u32 65535, %v2433_v12 }
 0x3bc   : > { %v1279_v0 = vshra.s32 %v2395_v63, 16  ;;  %v1249_v15 = vshra.s32 %v2418_v2, 16  ;;  %v2428_v20 = vcvt.s32.f32 %v1219_v14  ;;  %v2445_v9 = vcvt.s32.f32 %v1264_v21 }
 0x3bd   : > { %v1248_v61 = vand.u32 65535, %v2418_v2  ;;  %v1265_v2 = vcvt.s32.f32 %v1263_v6 }
 0x3be   : > { %v2376_v46 = vpop.xlane.xlu0 %1179  ;;  %v2399_v1 = vcvt.s32.f32 %v1279_v0  ;;  %v2430_v11 = vcvt.s32.f32 %v1249_v15  ;;  %v1220_v0 = vcvt.s32.f32 %v1218_v50 }
 0x3bf   : > { %vm1192_vm7 = vcmp.eq.f32.partialorder %v2362_v25, %v2376_v46  ;;  %v1250_v3 = vcvt.s32.f32 %v1248_v61 }
 0x3c0   : > { %v1370_v43 = vpop.permute.xlu2 %1369  ;;  %v2378_v47 = vpop.xlane.xlu1 %1182  ;;  %v1200_v17 = vsel %vm1192_vm7, %v2382_v56, 8  ;;  %vm1340_vm7 = vcmask 1046534  }
 0x3c1   : > { %v1416_v44 = vadd.f32 %v1370_v43, %v1168_v41  ;;  %v2436_v8 = vsel %vm1110_vm0, %v1200_v17, 2147483647  ;;  %vm1193_vm8 = vcmp.eq.f32.partialorder %v2365_v26, %v2378_v47 }
 0x3c2   : > { %v1294_v18 = vshra.s32 %v2436_v8, 16  ;;  %v1201_v19 = vsel %vm1193_vm8, %v2382_v56, 8  ;;  %v1293_v7 = vand.u32 65535, %v2436_v8  ;;  %vm1342_vm8 = vcmask 1047559  }
 0x3c3   : > { %1437 = vperm.xlu0 %1669, %v1416_v44   ;;  %v2450_v24 = vsel %vm1110_vm0, %v1201_v19, 2147483647  ;;  %v1233_v44 = vand.u32 65535, %v2386_v49 }
 0x3c4   : > { %v2447_v10 = vcvt.s32.f32 %v1294_v18  ;;  %v1309_v25 = vshra.s32 %v2450_v24, 16  ;;  %v1295_v14 = vcvt.s32.f32 %v1293_v7 }
 0x3c6   : > { %v2455_v26 = vcvt.s32.f32 %v1309_v25 }
 0x3c8   : > { %v1377_v52 = vpop.permute.xlu2 %1376 }
 0x3c9   : > { %v1417_v54 = vadd.f32 %v1377_v52, %v1171_v45  ;;  %v1278_v52 = vand.u32 65535, %v2395_v63 }
 0x3d0   : > { %v2458_v27 = vpop.permute.xlu2 %1390 }
 0x3d1   : > { %v1356_v48 = vpop.permute.xlu0 %1355  ;;  %v1419_v8 = vadd.f32 %v2458_v27, %v2374_v40 }
 0x3d2   : > { %v1414_v51 = vadd.f32 %v1356_v48, %v1162_v39  ;;  %v1235_v48 = vcvt.s32.f32 %v1233_v44 }
 0x3d4   : > { %1431 = vperm.xlu2 %1667, %v1414_v51  }
 0x3d8   : > { %v1363_v53 = vpop.permute.xlu1 %1362 }
 0x3d9   : > { %v1415_v22 = vadd.f32 %v1363_v53, %v1165_v42  ;;  %v2460_v28 = vpop.permute.xlu0 %1404 }
 0x3da   : > { %v1421_v12 = vadd.f32 %v2460_v28, %v2378_v47 }
 0x3db   : > { %1434 = vperm.xlu1 %1668, %v1415_v22   ;;  %v1280_v22 = vcvt.s32.f32 %v1278_v52 }
 0x3dc   : > { %1440 = vperm.xlu2 %1667, %v1417_v54  }
 0x3e0   : > { %v1384_v57 = vpop.permute.xlu1 %1383 }
 0x3e1   : > { %v1418_v59 = vadd.f32 %v1384_v57, %v1174_v38  ;;  %v1203_v57 = vand.u32 65535, %v2405_v4 }
 0x3e3   : > { %1443 = vperm.xlu1 %1668, %v1418_v59   ;;  %v1205_v59 = vcvt.s32.f32 %v1203_v57 }
 0x3e8   : > { %v1398_v29 = vpop.permute.xlu1 %1397 }
 0x3ed   : > { %1237 = vmin.xlane.f32.xlu0 %v2392_v62 }
 0x3f5   : > { %1282 = vmin.xlane.f32.xlu0 %v2399_v1 }
 0x405   : > { %1207 = vmin.xlane.f32.xlu2 %v2412_v60 }
 0x40d   : > { %1222 = vmin.xlane.f32.xlu1 %v2428_v20  ;;  %1252 = vmin.xlane.f32.xlu2 %v2430_v11 }
 0x415   : > { %1267 = vmin.xlane.f32.xlu1 %v2445_v9  ;;  %1297 = vmin.xlane.f32.xlu2 %v2447_v10 }
 0x41d   : > { %1312 = vmin.xlane.f32.xlu1 %v2455_v26 }
 0x42e   : > { %v1432_v30 = vpop.permute.xlu2 %1431 }
 0x42f   : > { %v1454_v33 = vperm.slane %v1432_v30, %v2382_v56 }
 0x435   : > { %v1438_v31 = vpop.permute.xlu0 %1437 }
 0x436   : > { %v1456_v34 = vperm.slane %v1438_v31, %v2382_v56  ;;  %v1441_v37 = vpop.permute.xlu2 %1440 }
 0x437   : > { %v1457_v38 = vperm.slane %v1441_v37, %v2382_v56 }
 0x44d   : > { %v1435_v32 = vpop.permute.xlu1 %1434 }
 0x44e   : > { %v1455_v23 = vperm.slane %v1435_v32, %v2382_v56 }
 0x450   : > { %v1462_v35 = vsel %vm1330_vm9, %v1455_v23, %v1454_v33 }
 0x451   : > { %v1463_v36 = vsel %vm1332_vm10, %v1456_v34, %v1462_v35 }
 0x452   : > { %v1464_v42 = vsel %vm1334_vm11, %v1457_v38, %v1463_v36 }
 0x455   : > { %v1444_v39 = vpop.permute.xlu1 %1443 }
 0x456   : > { %v1458_v41 = vperm.slane %v1444_v39, %v2382_v56 }
 0x458   : > { %v2471_v43 = vsel %vm1336_vm12, %v1458_v41, %v1464_v42 }
 0x460   : > { %v1238_v45 = vpop.xlane.xlu0 %1237 }
 0x461   : > { %vm1239_vm13 = vcmp.eq.f32.partialorder %v2392_v62, %v1238_v45 }
 0x462   : > { %v1240_v51 = vsel %vm1239_vm13, %v1235_v48, inf }
 0x463   : > { %1241 = vmin.xlane.f32.xlu1 %v1240_v51 }
 0x468   : > { %v2476_v53 = vpop.xlane.xlu0 %1282 }
 0x469   : > { %vm1284_vm14 = vcmp.eq.f32.partialorder %v2399_v1, %v2476_v53  ;;  %v1420_v1 = vadd.f32 %v1398_v29, %v2376_v46  ;;  %v1308_v46 = vand.u32 65535, %v2450_v24  ;;  %v1289_v42 = vcvt.f32.s32 %v2476_v53 }
 0x46a   : > { %v1285_v54 = vsel %vm1284_vm14, %v1280_v22, inf }
 0x46b   : > { %1286 = vmin.xlane.f32.xlu1 %v1285_v54 }
 0x478   : > { %v1208_v58 = vpop.xlane.xlu2 %1207 }
 0x479   : > { %vm1209_vm15 = vcmp.eq.f32.partialorder %v2412_v60, %v1208_v58  ;;  %v1214_v18 = vcvt.f32.s32 %v1208_v58 }
 0x47a   : > { %v1210_v49 = vsel %vm1209_vm15, %v1205_v59, inf }
 0x47b   : > { %1211 = vmin.xlane.f32.xlu0 %v1210_v49  ;;  %v1215_v30 = vshll.u32 %v1214_v18, 16  ;;  %v1290_v49 = vshll.u32 %v1289_v42, 16 }
 0x480   : > { %v1223_v62 = vpop.xlane.xlu1 %1222  ;;  %v1253_v63 = vpop.xlane.xlu2 %1252 }
 0x481   : > { %vm1224_vm1 = vcmp.eq.f32.partialorder %v2428_v20, %v1223_v62  ;;  %vm1254_vm2 = vcmp.eq.f32.partialorder %v2430_v11, %v1253_v63  ;;  %v1310_v20 = vcvt.s32.f32 %v1308_v46  ;;  %v1259_v25 = vcvt.f32.s32 %v1253_v63 }
 0x482   : > { %v1225_v4 = vsel %vm1224_vm1, %v1220_v0, inf  ;;  %v1255_v5 = vsel %vm1254_vm2, %v1250_v3, inf }
 0x483   : > { %1226 = vmin.xlane.f32.xlu2 %v1225_v4  ;;  %1256 = vmin.xlane.f32.xlu0 %v1255_v5  ;;  %v1260_v28 = vshll.u32 %v1259_v25, 16 }
 0x484   : > { %1449 = vperm.xlu1 %1668, %v1420_v1  }
 0x488   : > { %v1268_v60 = vpop.xlane.xlu1 %1267  ;;  %v1298_v13 = vpop.xlane.xlu2 %1297 }
 0x489   : > { %vm1269_vm3 = vcmp.eq.f32.partialorder %v2445_v9, %v1268_v60  ;;  %vm1299_vm4 = vcmp.eq.f32.partialorder %v2447_v10, %v1298_v13  ;;  %v1244_v9 = vcvt.f32.s32 %v1238_v45  ;;  %v1229_v10 = vcvt.f32.s32 %v1223_v62 }
 0x48a   : > { %v1270_v15 = vsel %vm1269_vm3, %v1265_v2, inf  ;;  %v1300_v16 = vsel %vm1299_vm4, %v1295_v14, inf  ;;  %v1274_v36 = vcvt.f32.s32 %v1268_v60  ;;  %v1304_v59 = vcvt.f32.s32 %v1298_v13 }
 0x48b   : > { %1271 = vmin.xlane.f32.xlu2 %v1270_v15  ;;  %1301 = vmin.xlane.f32.xlu0 %v1300_v16  ;;  %v1230_v32 = vshll.u32 %v1229_v10, 16 }
 0x48c   : > { %v1275_v52 = vshll.u32 %v1274_v36, 16  ;;  %v1305_v0 = vshll.u32 %v1304_v59, 16 }
 0x490   : > { %v1313_v17 = vpop.xlane.xlu1 %1312 }
 0x491   : > { %vm1314_vm5 = vcmp.eq.f32.partialorder %v2455_v26, %v1313_v17  ;;  %v1245_v26 = vshll.u32 %v1244_v9, 16  ;;  %v1319_v62 = vcvt.f32.s32 %v1313_v17  ;;  %v1670_v9 = vld [vmem:[%s2545_s11] ss:$0 sm:$0xff] (%p1123_p2)  ;;  %s1899_s11 = smov (%p1123_p2), 128  }
 0x492   : > { %v1315_v11 = vsel %vm1314_vm5, %v1310_v20, inf }
 0x493   : > { %1316 = vmin.xlane.f32.xlu2 %v1315_v11  ;;  %v1320_v5 = vshll.u32 %v1319_v62, 16 }
 0x49f   : > { %1452 = vperm.xlu0 %1669, %v1421_v12  }
 0x4ab   : > { %1446 = vperm.xlu2 %1667, %v1419_v8  }
 0x4d6   : > { %v1242_v19 = vpop.xlane.xlu1 %1241 }
 0x4d7   : > { %v1243_v29 = vcvt.f32.s32 %v1242_v19 }
 0x4d9   : > { %v1246_v34 = vadd.s32 %v1245_v26, %v1243_v29 }
 0x4db   : > { %v1324_v39 = vperm.slane %v1246_v34, %v2382_v56 }
 0x4de   : > { %v1287_v41 = vpop.xlane.xlu1 %1286 }
 0x4df   : > { %v1288_v22 = vcvt.f32.s32 %v1287_v41 }
 0x4e1   : > { %v1291_v63 = vadd.s32 %v1290_v49, %v1288_v22 }
 0x4e3   : > { %v1327_v6 = vperm.slane %v1291_v63, %v2382_v56 }
 0x4ee   : > { %v1212_v21 = vpop.xlane.xlu0 %1211 }
 0x4ef   : > { %v1213_v24 = vcvt.f32.s32 %v1212_v21 }
 0x4f1   : > { %v1216_v33 = vadd.s32 %v1215_v30, %v1213_v24 }
 0x4f3   : > { %v1322_v37 = vperm.slane %v1216_v33, %v2382_v56 }
 0x4f6   : > { %v1227_v31 = vpop.xlane.xlu2 %1226  ;;  %v1257_v47 = vpop.xlane.xlu0 %1256 }
 0x4f7   : > { %v1228_v23 = vcvt.f32.s32 %v1227_v31  ;;  %v1258_v35 = vcvt.f32.s32 %v1257_v47  ;;  %v1450_v16 = vpop.permute.xlu1 %1449 }
 0x4f8   : > { %v1460_v11 = vperm.slane %v1450_v16, %v2382_v56 }
 0x4f9   : > { %v1231_v40 = vadd.s32 %v1230_v32, %v1228_v23  ;;  %v1261_v27 = vadd.s32 %v1260_v28, %v1258_v35 }
 0x4fb   : > { %v1323_v38 = vperm.slane %v1231_v40, %v2382_v56  ;;  %v1325_v45 = vperm.slane %v1261_v27, %v2382_v56 }
 0x4fd   : > { %v1331_v44 = vsel %vm1330_vm9, %v1323_v38, %v1322_v37 }
 0x4fe   : > { %v1333_v48 = vsel %vm1332_vm10, %v1324_v39, %v1331_v44  ;;  %v1272_v51 = vpop.xlane.xlu2 %1271  ;;  %v1302_v58 = vpop.xlane.xlu0 %1301 }
 0x4ff   : > { %v1335_v54 = vsel %vm1334_vm11, %v1325_v45, %v1333_v48  ;;  %v1273_v57 = vcvt.f32.s32 %v1272_v51  ;;  %v1303_v61 = vcvt.f32.s32 %v1302_v58 }
 0x501   : > { %v1276_v50 = vadd.s32 %v1275_v52, %v1273_v57  ;;  %v1306_v1 = vadd.s32 %v1305_v0, %v1303_v61 }
 0x503   : > { %v1326_v53 = vperm.slane %v1276_v50, %v2382_v56  ;;  %v1328_v2 = vperm.slane %v1306_v1, %v2382_v56 }
 0x505   : > { %v1337_v3 = vsel %vm1336_vm12, %v1326_v53, %v1335_v54 }
 0x506   : > { %v1317_v4 = vpop.xlane.xlu2 %1316  ;;  %v1339_v13 = vsel %vm1338_vm6, %v1327_v6, %v1337_v3 }
 0x507   : > { %v1318_v7 = vcvt.f32.s32 %v1317_v4  ;;  %v1341_v15 = vsel %vm1340_vm7, %v1328_v2, %v1339_v13 }
 0x509   : > { %v1321_v60 = vadd.s32 %v1320_v5, %v1318_v7 }
 0x50b   : > { %v1329_v14 = vperm.slane %v1321_v60, %v2382_v56 }
 0x50d   : > { %v1343_v46 = vsel %vm1342_vm8, %v1329_v14, %v1341_v15 }
 0x50e   : > { %v1447_v17 = vpop.permute.xlu2 %1446  ;;  %1346 = vst.msk [vmem:[%s1345_s9] sm:$0xff] %vm1110_vm0, %v1343_v46 }
 0x50f   : > { %v1459_v20 = vperm.slane %v1447_v17, %v2382_v56  ;;  %1499 = dma.vmem_to_hbm [thread:$0]  (%p1123_p2), %s1492_s1, 1024, %s1494_s17, [#allocation16], %s1899_s11, %s1899_s11, %s1900_s19  }
 0x511   : > { %v1466_v12 = vsel %vm1338_vm6, %v1459_v20, %v2471_v43  ;;  %v1453_v8 = vpop.permute.xlu0 %1452  ;;  %1125 = sbr.rel (!%p1123_p2) target bundleno = 822 (0x336), region = 146 }
 0x512   : > { %v1467_v21 = vsel %vm1340_vm7, %v1460_v11, %v1466_v12  ;;  %v1461_v18 = vperm.slane %v1453_v8, %v2382_v56 }
 0x514   : > { %v1468_v19 = vsel %vm1342_vm8, %v1461_v18, %v1467_v21  }
 0x515   : > { %v2549_v59 = vmov %v1468_v19  ;;  %v1474_v56 = vadd.f32 (%p1123_p2), %v1670_v9, %v1468_v19 }
 0x517   :  { %1475 = vst.msk [vmem:[#allocation14] sm:$0xff] %vm1110_vm0, %v1474_v56 }
 0x518   :  { %1486 = dma.vmem_to_hbm [thread:$0]  %s1482_s16, 128, %s1484_s30, [#allocation8]  }
 0x519   :  { %1853 = dma.done.wait [#allocation8], 128  }
 0x51a   :  { %1854 = vsyncadd [#allocation8], 4294967168 }
 0x51b   :  { %1855 = dma.done.wait [#allocation16], 1024  }
 0x51c   :  { %1856 = vsyncadd [#allocation16], 4294966272 }
 0x51d   :  { %1508 = vsyncpa [#allocation7], 1 }
 0x51e   :  { %1509 = vsyncpa [#allocation10], 1 }
 0x51f   :  { %1510 = vsyncpa [#allocation13], 1 }
 0x520   :  { %1511 = vsyncpa [#allocation8], 1 }
 0x521   :  { %1512 = vsyncpa [#allocation16], 1 }

</bundles_post_ra>
